<compile_context>
chip_gen: v7x
topology: tpu7x:2x2x1
jax: 0.10.0
libtpu: 0.0.40
codegen_flags: <defaults>
</compile_context>

<pallas_src>
import functools

import jax
import jax.numpy as jnp
from jax.experimental import pallas as pl
from jax.experimental.pallas import tpu as pltpu


def _round_up(x, m):
    return ((x + m - 1) // m) * m


def _edge_mlp_kernel(idx_ref, bonds_ref, aw_ref, w1c_ref, w2_ref, b2_ref,
                     w3_ref, b3_ref, o_ref):
    te = bonds_ref.shape[0]          # row tile (edges)
    two_n = aw_ref.shape[0]          # 2 * padded number of atoms
    n_pad = two_n // 2

    # In-kernel gather of BOTH atom endpoints as one exact one-hot matmul:
    #   a1@W1a + b1 + a2@W1b == onehot([idx1, idx2+n_pad]) @ [[W1a.T rows + b1],[W1b rows]]
    # (b1 already folded into the first half of `aw` in the wrapper).
    col = jax.lax.broadcasted_iota(jnp.int32, (te, two_n), 1)
    hit = (col == idx_ref[:, 0:1]) | (col == idx_ref[:, 1:2] + n_pad)
    oh = hit.astype(jnp.bfloat16)                               # [te, 2*n_pad]

    # Layer 1: gather term + bonds @ W1c   (bf16 MXU, f32 accumulation)
    h = jnp.dot(oh, aw_ref[...], preferred_element_type=jnp.float32)
    h = h + jnp.dot(bonds_ref[...].astype(jnp.bfloat16), w1c_ref[...],
                    preferred_element_type=jnp.float32)
    h = jnp.maximum(h, 0.0)                                     # ReLU in f32

    # Layer 2
    h = jnp.dot(h.astype(jnp.bfloat16), w2_ref[...],
                preferred_element_type=jnp.float32)
    h = jnp.maximum(h + b2_ref[...], 0.0)

    # Layer 3 (no activation)
    h = jnp.dot(h.astype(jnp.bfloat16), w3_ref[...],
                preferred_element_type=jnp.float32)
    o_ref[...] = h + b3_ref[...]


@functools.partial(jax.jit, static_argnames=("tile_e",))
def edge_update(bonds, bond_atom_1, bond_atom_2, atoms, params, *, tile_e=2048):
    """JAX/Pallas equivalent of EdgeUpdate.forward."""
    w1, b1, w2, b2, w3, b3 = params
    E, bond_dim = bonds.shape
    N, atom_info = atoms.shape
    assert 2 * atom_info + bond_dim == w1.shape[0]
    d_out = w3.shape[1]

    # Pre-contract the (tiny) atoms table with the atom row-slices of W1; fold
    # b1 into the first slice (each one-hot half selects exactly one row).
    atoms_f = atoms.astype(jnp.float32)
    aw1 = atoms_f @ w1[:atom_info] + b1
    aw2 = atoms_f @ w1[atom_info:2 * atom_info]
    n_pad = _round_up(max(N, 1), 16)
    aw1 = jnp.pad(aw1, ((0, n_pad - N), (0, 0)))
    aw2 = jnp.pad(aw2, ((0, n_pad - N), (0, 0)))
    aw = jnp.concatenate([aw1, aw2], axis=0).astype(jnp.bfloat16)  # [2*n_pad,128]

    # Row tiling: an (ideally even, >=2 when E>256) number of balanced grid
    # steps so both v7x TensorCores get work, with 256-row granularity.
    n_steps = pl.cdiv(E, tile_e)
    if E > 256:
        n_steps = max(n_steps, 2)
    if n_steps > 1 and n_steps % 2:
        n_steps += 1
    tile = _round_up(pl.cdiv(E, n_steps), 256)
    e_pad = tile * n_steps
    grid = (n_steps,)

    # Streaming inputs: f32 bond features (bf16 cast happens in-kernel) and a
    # single merged (E, 2) int32 index array.
    bonds_p = jnp.pad(bonds.astype(jnp.float32), ((0, e_pad - E), (0, 0)))
    idx = jnp.stack([bond_atom_1.astype(jnp.int32),
                     bond_atom_2.astype(jnp.int32)], axis=1)
    idx = jnp.pad(idx, ((0, e_pad - E), (0, 0)))

    w1c = w1[2 * atom_info:].astype(jnp.bfloat16)
    w2b = w2.astype(jnp.bfloat16)
    w3b = w3.astype(jnp.bfloat16)
    b2f = b2.astype(jnp.float32)
    b3f = b3.astype(jnp.float32)

    def full_spec(arr):  # whole array, same block every grid step -> DMA elided
        return pl.BlockSpec(arr.shape, lambda i: (0, 0))

    # Conservative per-step VMEM estimate (lane-padded, double-buffered).
    def blk_bytes(rows, cols, itemsize):
        return rows * _round_up(cols, 128) * itemsize
    vmem_est = 2 * (blk_bytes(tile, 2, 4)             # idx block
                    + blk_bytes(tile, bond_dim, 4)    # bond block (f32)
                    + blk_bytes(tile, d_out, 4))      # output block (f32)
    vmem_est += 2 * (blk_bytes(2 * n_pad, 128, 2) + blk_bytes(bond_dim, 128, 2)
                     + blk_bytes(128, 64, 2) + blk_bytes(64, d_out, 2)
                     + blk_bytes(1, 64, 4) + blk_bytes(1, d_out, 4))
    vmem_est += 4 * tile * 128 + (1 << 20)            # intermediates + slack
    vmem_limit = None
    if vmem_est > 14 * (1 << 20):                     # above v5e default scoped VMEM
        vmem_limit = min(2 * vmem_est, 56 * (1 << 20))   # stay under v7x's 64 MiB

    out = pl.pallas_call(
        _edge_mlp_kernel,
        out_shape=jax.ShapeDtypeStruct((e_pad, d_out), jnp.float32),
        grid_spec=pltpu.PrefetchScalarGridSpec(
            num_scalar_prefetch=0,
            grid=grid,
            in_specs=[
                pl.BlockSpec((tile, 2), lambda i: (i, 0)),          # merged idx
                pl.BlockSpec((tile, bond_dim), lambda i: (i, 0)),   # bond feats
                full_spec(aw), full_spec(w1c),
                full_spec(w2b), full_spec(b2f),
                full_spec(w3b), full_spec(b3f),
            ],
            out_specs=pl.BlockSpec((tile, d_out), lambda i: (i, 0)),
        ),
        compiler_params=pltpu.CompilerParams(
            dimension_semantics=("parallel",),
            vmem_limit_bytes=vmem_limit),
    )(idx, bonds_p, aw, w1c, w2b, b2f, w3b, b3f)

    return out[:E]


def init_phi_e_params(key):
    """Deterministic init of Linear(96,128), Linear(128,64), Linear(64,32)."""
    dims = [(96, 128), (128, 64), (64, 32)]
    params = []
    for d_in, d_out in dims:
        key, kw, kb = jax.random.split(key, 3)
        bound = 1.0 / jnp.sqrt(d_in)
        w = jax.random.uniform(kw, (d_in, d_out), jnp.float32, -bound, bound)
        b = jax.random.uniform(kb, (1, d_out), jnp.float32, -bound, bound)
        params += [w, b]
    return tuple(params)


def _reference(bonds, bond_atom_1, bond_atom_2, atoms, params):
    w1, b1, w2, b2, w3, b3 = params
    x = jnp.concatenate([atoms[bond_atom_1], atoms[bond_atom_2], bonds], axis=1)
    h = jnp.maximum(x @ w1 + b1, 0.0)
    h = jnp.maximum(h @ w2 + b2, 0.0)
    return h @ w3 + b3


if __name__ == "__main__":
    key = jax.random.PRNGKey(0)
    k_p, k_bonds, k_atoms, k_i1, k_i2, k_rest = jax.random.split(key, 6)

    params = init_phi_e_params(k_p)

    # Small shapes consistent with the module (atom_info=32, bond_dim=32 -> 96).
    num_atoms, atom_info, bond_dim, num_bonds = 12, 32, 32, 16
    bonds = jax.random.normal(k_bonds, (num_bonds, bond_dim), jnp.float32)
    atoms = jax.random.normal(k_atoms, (num_atoms, atom_info), jnp.float32)
    bond_atom_1 = jax.random.randint(k_i1, (num_bonds,), 0, num_atoms)
    bond_atom_2 = jax.random.randint(k_i2, (num_bonds,), 0, num_atoms)

    out = jax.block_until_ready(
        edge_update(bonds, bond_atom_1, bond_atom_2, atoms, params))
    ref = _reference(bonds, bond_atom_1, bond_atom_2, atoms, params)
    assert out.shape == (num_bonds, 32)
    # bf16 MXU inputs (f32 accumulation) -> loosened tolerance vs f32 reference.
    assert jnp.allclose(out, ref, atol=3e-2, rtol=3e-2), \
        float(jnp.max(jnp.abs(out - ref)))

    # Second case: non-tile-multiple edge count -> padding + grid of 2 balanced
    # steps (both v7x cores active).
    k_b2, k_a2, k_i3, k_i4 = jax.random.split(k_rest, 4)
    E2, N2 = 2304, 40
    bonds2 = jax.random.normal(k_b2, (E2, bond_dim), jnp.float32)
    atoms2 = jax.random.normal(k_a2, (N2, atom_info), jnp.float32)
    i1 = jax.random.randint(k_i3, (E2,), 0, N2)
    i2 = jax.random.randint(k_i4, (E2,), 0, N2)
    out2 = jax.block_until_ready(
        edge_update(bonds2, i1, i2, atoms2, params))
    ref2 = _reference(bonds2, i1, i2, atoms2, params)
    assert out2.shape == (E2, 32)
    assert jnp.allclose(out2, ref2, atol=3e-2, rtol=3e-2), \
        float(jnp.max(jnp.abs(out2 - ref2)))

    print("KERNEL_OK")
</pallas_src>

<mosaic_0001>
module attributes {stable_mosaic.version = 11 : i64} {
  func.func @_edge_mlp_kernel(%arg0: i32, %arg1: memref<256x2xi32, #tpu.memory_space<vmem>>, %arg2: memref<256x32xf32, #tpu.memory_space<vmem>>, %arg3: memref<32x128xbf16, #tpu.memory_space<vmem>>, %arg4: memref<32x128xbf16, #tpu.memory_space<vmem>>, %arg5: memref<128x64xbf16, #tpu.memory_space<vmem>>, %arg6: memref<1x64xf32, #tpu.memory_space<vmem>>, %arg7: memref<64x32xbf16, #tpu.memory_space<vmem>>, %arg8: memref<1x32xf32, #tpu.memory_space<vmem>>, %arg9: memref<256x32xf32, #tpu.memory_space<vmem>>) attributes {dimension_semantics = [#tpu.dimension_semantics<parallel>], iteration_bounds = array<i64: 1>, scalar_prefetch = 0 : i64, scratch_operands = 0 : i64, tpu.core_type = #tpu.core_type<tc>, window_params = [{transform_indices = @transform_0, window_bounds = array<i64: 256, 2>}, {transform_indices = @transform_1, window_bounds = array<i64: 256, 32>}, {pipeline_mode = #tpu.pipeline_mode<synchronous>, transform_indices = @transform_2, window_bounds = array<i64: 32, 128>}, {pipeline_mode = #tpu.pipeline_mode<synchronous>, transform_indices = @transform_3, window_bounds = array<i64: 32, 128>}, {pipeline_mode = #tpu.pipeline_mode<synchronous>, transform_indices = @transform_4, window_bounds = array<i64: 128, 64>}, {pipeline_mode = #tpu.pipeline_mode<synchronous>, transform_indices = @transform_5, window_bounds = array<i64: 1, 64>}, {pipeline_mode = #tpu.pipeline_mode<synchronous>, transform_indices = @transform_6, window_bounds = array<i64: 64, 32>}, {pipeline_mode = #tpu.pipeline_mode<synchronous>, transform_indices = @transform_7, window_bounds = array<i64: 1, 32>}, {transform_indices = @transform_8, window_bounds = array<i64: 256, 32>}]} {
    %0 = tpu.iota {dimensions = array<i32: 1>} : vector<256x32xi32>
    %c0 = arith.constant 0 : index
    %c0_0 = arith.constant 0 : index
    %1 = vector.load %arg1[%c0, %c0_0] : memref<256x2xi32, #tpu.memory_space<vmem>>, vector<256x1xi32>
    %2 = vector.broadcast %1 : vector<256x1xi32> to vector<256x32xi32>
    %3 = arith.cmpi eq, %0, %2 : vector<256x32xi32>
    %c0_1 = arith.constant 0 : index
    %c1 = arith.constant 1 : index
    %4 = vector.load %arg1[%c0_1, %c1] : memref<256x2xi32, #tpu.memory_space<vmem>>, vector<256x1xi32>
    %c16_i32 = arith.constant 16 : i32
    %5 = vector.broadcast %c16_i32 : i32 to vector<256x1xi32>
    %6 = arith.addi %4, %5 : vector<256x1xi32>
    %7 = vector.broadcast %6 : vector<256x1xi32> to vector<256x32xi32>
    %8 = arith.cmpi eq, %0, %7 : vector<256x32xi32>
    %9 = arith.ori %3, %8 : vector<256x32xi1>
    %10 = arith.extui %9 : vector<256x32xi1> to vector<256x32xi32>
    %11 = arith.sitofp %10 : vector<256x32xi32> to vector<256x32xf32>
    %12 = arith.truncf %11 : vector<256x32xf32> to vector<256x32xbf16>
    %c0_2 = arith.constant 0 : index
    %c0_3 = arith.constant 0 : index
    %13 = vector.load %arg3[%c0_2, %c0_3] : memref<32x128xbf16, #tpu.memory_space<vmem>>, vector<32x128xbf16>
    %cst = arith.constant dense<0.000000e+00> : vector<256x128xf32>
    %14 = tpu.matmul %12, %13, %cst {dimension_numbers = #tpu.dot_dimension_numbers<[1], [0], [0], [1], [0, 0, 1, 1], [], []>} : vector<256x32xbf16>, vector<32x128xbf16>, vector<256x128xf32> -> vector<256x128xf32>
    %c0_4 = arith.constant 0 : index
    %c0_5 = arith.constant 0 : index
    %15 = vector.load %arg2[%c0_4, %c0_5] : memref<256x32xf32, #tpu.memory_space<vmem>>, vector<256x32xf32>
    %16 = arith.truncf %15 : vector<256x32xf32> to vector<256x32xbf16>
    %c0_6 = arith.constant 0 : index
    %c0_7 = arith.constant 0 : index
    %17 = vector.load %arg4[%c0_6, %c0_7] : memref<32x128xbf16, #tpu.memory_space<vmem>>, vector<32x128xbf16>
    %cst_8 = arith.constant dense<0.000000e+00> : vector<256x128xf32>
    %18 = tpu.matmul %16, %17, %cst_8 {dimension_numbers = #tpu.dot_dimension_numbers<[1], [0], [0], [1], [0, 0, 1, 1], [], []>} : vector<256x32xbf16>, vector<32x128xbf16>, vector<256x128xf32> -> vector<256x128xf32>
    %19 = arith.addf %14, %18 : vector<256x128xf32>
    %cst_9 = arith.constant 0.000000e+00 : f32
    %20 = vector.broadcast %cst_9 : f32 to vector<256x128xf32>
    %21 = arith.maximumf %19, %20 : vector<256x128xf32>
    %22 = arith.truncf %21 : vector<256x128xf32> to vector<256x128xbf16>
    %c0_10 = arith.constant 0 : index
    %c0_11 = arith.constant 0 : index
    %23 = vector.load %arg5[%c0_10, %c0_11] : memref<128x64xbf16, #tpu.memory_space<vmem>>, vector<128x64xbf16>
    %cst_12 = arith.constant dense<0.000000e+00> : vector<256x64xf32>
    %24 = tpu.matmul %22, %23, %cst_12 {dimension_numbers = #tpu.dot_dimension_numbers<[1], [0], [0], [1], [0, 0, 1, 1], [], []>} : vector<256x128xbf16>, vector<128x64xbf16>, vector<256x64xf32> -> vector<256x64xf32>
    %c0_13 = arith.constant 0 : index
    %c0_14 = arith.constant 0 : index
    %25 = vector.load %arg6[%c0_13, %c0_14] : memref<1x64xf32, #tpu.memory_space<vmem>>, vector<1x64xf32>
    %26 = vector.broadcast %25 : vector<1x64xf32> to vector<256x64xf32>
    %27 = arith.addf %24, %26 : vector<256x64xf32>
    %cst_15 = arith.constant 0.000000e+00 : f32
    %28 = vector.broadcast %cst_15 : f32 to vector<256x64xf32>
    %29 = arith.maximumf %27, %28 : vector<256x64xf32>
    %30 = arith.truncf %29 : vector<256x64xf32> to vector<256x64xbf16>
    %c0_16 = arith.constant 0 : index
    %c0_17 = arith.constant 0 : index
    %31 = vector.load %arg7[%c0_16, %c0_17] : memref<64x32xbf16, #tpu.memory_space<vmem>>, vector<64x32xbf16>
    %cst_18 = arith.constant dense<0.000000e+00> : vector<256x32xf32>
    %32 = tpu.matmul %30, %31, %cst_18 {dimension_numbers = #tpu.dot_dimension_numbers<[1], [0], [0], [1], [0, 0, 1, 1], [], []>} : vector<256x64xbf16>, vector<64x32xbf16>, vector<256x32xf32> -> vector<256x32xf32>
    %c0_19 = arith.constant 0 : index
    %c0_20 = arith.constant 0 : index
    %33 = vector.load %arg8[%c0_19, %c0_20] : memref<1x32xf32, #tpu.memory_space<vmem>>, vector<1x32xf32>
    %34 = vector.broadcast %33 : vector<1x32xf32> to vector<256x32xf32>
    %35 = arith.addf %32, %34 : vector<256x32xf32>
    %c0_21 = arith.constant 0 : index
    %c0_22 = arith.constant 0 : index
    %36 = vector.load %arg9[%c0_21, %c0_22] : memref<256x32xf32, #tpu.memory_space<vmem>>, vector<256x32xf32>
    tpu.vector_store %arg9[%c0_21, %c0_22], %35 {strides = array<i32>} : memref<256x32xf32, #tpu.memory_space<vmem>>, vector<256x32xf32>,
    return
  }
  func.func @transform_0(%arg0: i32) -> (i32, i32) {
    %c0_i32 = arith.constant 0 : i32
    %c0_i32_0 = arith.constant 0 : i32
    return %arg0, %c0_i32 : i32, i32
  }
  func.func @transform_1(%arg0: i32) -> (i32, i32) {
    %c0_i32 = arith.constant 0 : i32
    %c0_i32_0 = arith.constant 0 : i32
    return %arg0, %c0_i32 : i32, i32
  }
  func.func @transform_2(%arg0: i32) -> (i32, i32) {
    %c0_i32 = arith.constant 0 : i32
    %c0_i32_0 = arith.constant 0 : i32
    %c0_i32_1 = arith.constant 0 : i32
    return %c0_i32, %c0_i32_0 : i32, i32
  }
  func.func @transform_3(%arg0: i32) -> (i32, i32) {
    %c0_i32 = arith.constant 0 : i32
    %c0_i32_0 = arith.constant 0 : i32
    %c0_i32_1 = arith.constant 0 : i32
    return %c0_i32, %c0_i32_0 : i32, i32
  }
  func.func @transform_4(%arg0: i32) -> (i32, i32) {
    %c0_i32 = arith.constant 0 : i32
    %c0_i32_0 = arith.constant 0 : i32
    %c0_i32_1 = arith.constant 0 : i32
    return %c0_i32, %c0_i32_0 : i32, i32
  }
  func.func @transform_5(%arg0: i32) -> (i32, i32) {
    %c0_i32 = arith.constant 0 : i32
    %c0_i32_0 = arith.constant 0 : i32
    %c0_i32_1 = arith.constant 0 : i32
    return %c0_i32, %c0_i32_0 : i32, i32
  }
  func.func @transform_6(%arg0: i32) -> (i32, i32) {
    %c0_i32 = arith.constant 0 : i32
    %c0_i32_0 = arith.constant 0 : i32
    %c0_i32_1 = arith.constant 0 : i32
    return %c0_i32, %c0_i32_0 : i32, i32
  }
  func.func @transform_7(%arg0: i32) -> (i32, i32) {
    %c0_i32 = arith.constant 0 : i32
    %c0_i32_0 = arith.constant 0 : i32
    %c0_i32_1 = arith.constant 0 : i32
    return %c0_i32, %c0_i32_0 : i32, i32
  }
  func.func @transform_8(%arg0: i32) -> (i32, i32) {
    %c0_i32 = arith.constant 0 : i32
    %c0_i32_0 = arith.constant 0 : i32
    return %arg0, %c0_i32 : i32, i32
  }
}

</mosaic_0001>

<bundles_post_ra>
// kernel: edge_update.1
= control target key start
LH: loop header
LB: loop body
LE: loop exit
PB: predicated region body
PF: predicated region fallthrough
CT: control target
= control target key end

     0   :  { %v2015_v0 = vmov 1   ;;  %vm532_vm0 = vcmask 261120   ;;  %v2016_v17 = vmov 0   ;;  %s2743_s0 = inlined_call_operand.vmem [shape: s32[256,2], index: 0, kind: input, shape index: {}]   ;;  %s2744_s3 = inlined_call_operand.vmem [shape: bf16[32,128], index: 3, kind: input, shape index: {}]   ;;  %s2745_s1 = inlined_call_operand.vmem [shape: f32[256,32], index: 1, kind: input, shape index: {}]   ;;  %s2746_s2 = inlined_call_operand.vmem [shape: bf16[32,128], index: 2, kind: input, shape index: {}]   ;;  %s2747_s4 = inlined_call_operand.vmem [shape: bf16[128,64], index: 4, kind: input, shape index: {}]   ;;  %s2748_s6 = inlined_call_operand.vmem [shape: bf16[64,32], index: 6, kind: input, shape index: {}]   ;;  %s2749_s5 = inlined_call_operand.vmem [shape: f32[1,64], index: 5, kind: input, shape index: {}]   ;;  %s2750_s7 = inlined_call_operand.vmem [shape: f32[1,32], index: 7, kind: input, shape index: {}]   ;;  %s2751_s8 = inlined_call_operand.vmem [shape: f32[256,32], index: 8, kind: output, shape index: {}]  }
   0x1   :  { %1967 = vset.pattern.permute.xlu0 %v2015_v0  ;;  %1965 = vset.pattern.permute.xlu1 %v2015_v0  ;;  %v2068_v1 = vld [vmem:[%s2743_s0 + $0x10] sm:$0xff]  ;;  %v2073_v2 = vld [vmem:[%s2743_s0] sm:$0xff]  ;;  %v2085_v6 = vld [vmem:[%s2743_s0 + $0x8] sm:$0xff] }
   0x2   :  { %v2078_v3 = vld [vmem:[%s2743_s0 + $0x30] sm:$0xff]  ;;  %v194_v4 = vadd.s32 16, %v2068_v1  ;;  %v192_v5 = vadd.s32 16, %v2073_v2  ;;  %v193_v8 = vadd.s32 16, %v2085_v6  ;;  %v35_v11 = vld [vmem:[%s2743_s0 + $0x18] sm:$0xff]  ;;  %v1999_v12 = vld [vmem:[%s2744_s3] sm:$0xff]  }
   0x3   :  { %v198_v7 = vadd.s32 16, %v2078_v3  ;;  %v2092_v9 = vld [vmem:[%s2743_s0 + $0x50] sm:$0xff]  ;;  %1754 = vmatprep.subr.bf16.mxu0 %v1999_v12  ;;  %v2000_v14 = vld [vmem:[%s2744_s3 + $0x8] sm:$0xff]   ;;  %v468_v15 = vld [vmem:[%s2745_s1] sm:$0xff]  ;;  %v195_v25 = vadd.s32 16, %v35_v11 }
   0x4   :  { %231 = vperm.xlu0 %1967, %v194_v4   ;;  %225 = vperm.xlu1 %1965, %v192_v5   ;;  %v202_v10 = vadd.s32 16, %v2092_v9  ;;  %v2104_v13 = vld [vmem:[%s2743_s0 + $0x70] sm:$0xff]  ;;  %v469_v16 = vld [vmem:[%s2745_s1 + $0x8] sm:$0xff]  ;;  %v471_v21 = vld [vmem:[%s2745_s1 + $0x18] sm:$0xff] }
   0x5   :  { %1755 = vmatpush3.bf16.msra.mxu0 %v1999_v12  ;;  %v206_v18 = vadd.s32 16, %v2104_v13  ;;  %v500_v19 = vpack.c.bf16 %v469_v16, %v468_v15  ;;  %v470_v20 = vld [vmem:[%s2745_s1 + $0x10] sm:$0xff]  ;;  %v472_v23 = vld [vmem:[%s2745_s1 + $0x20] sm:$0xff]  ;;  %v473_v24 = vld [vmem:[%s2745_s1 + $0x28] sm:$0xff] }
   0x6   :  { %v2126_v22 = vld [vmem:[%s2743_s0 + $0x90] sm:$0xff]  ;;  %1756 = vmatprep.subr.bf16.mxu0 %v2000_v14  ;;  %v501_v26 = vpack.c.bf16 %v471_v21, %v470_v20  ;;  %v502_v27 = vpack.c.bf16 %v473_v24, %v472_v23  ;;  %v475_v31 = vld [vmem:[%s2745_s1 + $0x38] sm:$0xff]  ;;  %v36_v32 = vld [vmem:[%s2743_s0 + $0x20] sm:$0xff] }
   0x7   :  { %1758 = vmatprep.mubr.msk.bf16.mxu0 %vm532_vm0, %v500_v19  ;;  %v210_v28 = vadd.s32 16, %v2126_v22  ;;  %v2140_v29 = vld [vmem:[%s2743_s0 + $0xb0] sm:$0xff]  ;;  %v476_v34 = vld [vmem:[%s2745_s1 + $0x40] sm:$0xff]  ;;  %v477_v35 = vld [vmem:[%s2745_s1 + $0x48] sm:$0xff]  ;;  %v196_v39 = vadd.s32 16, %v36_v32 }
   0x8   :  { %243 = vperm.xlu0 %1967, %v198_v7   ;;  %228 = vperm.xlu1 %1965, %v193_v8   ;;  %v474_v30 = vld [vmem:[%s2745_s1 + $0x30] sm:$0xff]  ;;  %v214_v33 = vadd.s32 16, %v2140_v29  ;;  %v504_v38 = vpack.c.bf16 %v477_v35, %v476_v34  ;;  %v37_v41 = vld [vmem:[%s2743_s0 + $0x28] sm:$0xff]  ;;  %v479_v43 = vld [vmem:[%s2745_s1 + $0x58] sm:$0xff] }
   0x9   :  { %1757 = vmatpush3.bf16.msra.mxu0 %v2000_v14  ;;  %v2163_v36 = vld [vmem:[%s2743_s0 + $0xd0] sm:$0xff]  ;;  %v503_v37 = vpack.c.bf16 %v475_v31, %v474_v30  ;;  %v197_v44 = vadd.s32 16, %v37_v41  ;;  %v480_v45 = vld [vmem:[%s2745_s1 + $0x60] sm:$0xff]  ;;  %v481_v46 = vld [vmem:[%s2745_s1 + $0x68] sm:$0xff] }
   0xa   :  { %v218_v40 = vadd.s32 16, %v2163_v36  ;;  %v478_v42 = vld [vmem:[%s2745_s1 + $0x50] sm:$0xff]  ;;  %v506_v48 = vpack.c.bf16 %v481_v46, %v480_v45  ;;  %v39_v49 = vld [vmem:[%s2743_s0 + $0x38] sm:$0xff]  ;;  %v484_v52 = vld [vmem:[%s2745_s1 + $0x80] sm:$0xff] }
   0xb   :  { %v505_v47 = vpack.c.bf16 %v479_v43, %v478_v42  ;;  %v482_v50 = vld [vmem:[%s2745_s1 + $0x70] sm:$0xff]  ;;  %v483_v51 = vld [vmem:[%s2745_s1 + $0x78] sm:$0xff]  ;;  %v485_v53 = vld [vmem:[%s2745_s1 + $0x88] sm:$0xff]  ;;  %v199_v55 = vadd.s32 16, %v39_v49 }
   0xc   :  { %255 = vperm.xlu0 %1967, %v202_v10   ;;  %1966 = vset.pattern.permute.xlu1 %v2016_v17  ;;  %v2001_v54 = vld [vmem:[%s2746_s2] sm:$0xff]   ;;  %v507_v56 = vpack.c.bf16 %v483_v51, %v482_v50  ;;  %v508_v57 = vpack.c.bf16 %v485_v53, %v484_v52  ;;  %v2002_v58 = vld [vmem:[%s2746_s2 + $0x8] sm:$0xff]   ;;  %v486_v59 = vld [vmem:[%s2745_s1 + $0x90] sm:$0xff] }
   0xd   :  { %74 = vperm.xlu1 %1966, %v35_v11   ;;  %1759 = vmatmul.mubr.msk.bf16.vlgmr.msra.gmra.mrb[0].mxu0 %vm532_vm0, %v501_v26  ;;  %v487_v60 = vld [vmem:[%s2745_s1 + $0x98] sm:$0xff]  ;;  %v40_v61 = vld [vmem:[%s2743_s0 + $0x40] sm:$0xff]  ;;  %v489_v63 = vld [vmem:[%s2745_s1 + $0xa8] sm:$0xff] }
   0xe   :  { %1762 = vmatprep.mubr.msk.bf16.mxu0 %vm532_vm0, %v502_v27  ;;  %1790 = vmatprep.subr.bf16.mxu0 %v2001_v54  ;;  %v488_v62 = vld [vmem:[%s2745_s1 + $0xa0] sm:$0xff]  ;;  %v200_v4 = vadd.s32 16, %v40_v61  ;;  %v41_v5 = vld [vmem:[%s2743_s0 + $0x48] sm:$0xff]  ;;  %v491_v7 = vld [vmem:[%s2745_s1 + $0xb8] sm:$0xff] }
   0xf   :  { %1791 = vmatpush3.bf16.msra.mxu0 %v2001_v54  ;;  %v492_v8 = vld [vmem:[%s2745_s1 + $0xc0] sm:$0xff]  ;;  %v493_v10 = vld [vmem:[%s2745_s1 + $0xc8] sm:$0xff]  ;;  %v43_v15 = vld [vmem:[%s2743_s0 + $0x58] sm:$0xff] }
  0x10   :  { %267 = vperm.xlu0 %1967, %v206_v18   ;;  %1792 = vmatprep.subr.bf16.mxu0 %v2002_v58  ;;  %v512_v12 = vpack.c.bf16 %v493_v10, %v492_v8  ;;  %v45_v14 = vld [vmem:[%s2743_s0 + $0x68] sm:$0xff]  ;;  %v494_v16 = vld [vmem:[%s2745_s1 + $0xd0] sm:$0xff]  ;;  %v496_v18 = vld [vmem:[%s2745_s1 + $0xe0] sm:$0xff]  ;;  %v203_v20 = vadd.s32 16, %v43_v15  ;;  %v2017_v8 = vmov 0.0  }
  0x11   :  { %1968 = vset.pattern.permute.xlu1 %v2015_v0  ;;  %v497_v19 = vld [vmem:[%s2745_s1 + $0xe8] sm:$0xff]  ;;  %v499_v26 = vld [vmem:[%s2745_s1 + $0xf8] sm:$0xff]  ;;  %v205_v31 = vadd.s32 16, %v45_v14  ;;  %v48_v34 = vld [vmem:[%s2743_s0 + $0x80] sm:$0xff] }
  0x12   :  { %234 = vperm.xlu1 %1968, %v195_v25   ;;  %v514_v23 = vpack.c.bf16 %v497_v19, %v496_v18  ;;  %v49_v24 = vld [vmem:[%s2743_s0 + $0x88] sm:$0xff]  ;;  %v498_v25 = vld [vmem:[%s2745_s1 + $0xf0] sm:$0xff]  ;;  %v56_v52 = vld [vmem:[%s2743_s0 + $0xc0] sm:$0xff] }
  0x13   :  { %1793 = vmatpush3.bf16.msra.mxu0 %v2002_v58  ;;  %v515_v27 = vpack.c.bf16 %v499_v26, %v498_v25  ;;  %v53_v30 = vld [vmem:[%s2743_s0 + $0xa8] sm:$0xff]  ;;  %v62_v35 = vld [vmem:[%s2743_s0 + $0xf0] sm:$0xff]  ;;  %v216_v54 = vadd.s32 16, %v56_v52 }
  0x14   :  { %279 = vperm.xlu0 %1967, %v210_v28   ;;  %v213_v43 = vadd.s32 16, %v53_v30 }
  0x15   :  { %1763 = vmatmul.mubr.msk.bf16.gmra.mrb[4].mxu0 %vm532_vm0, %v503_v37  ;;  %v222_v37 = vadd.s32 16, %v62_v35 }
  0x16   :  { %1969 = vset.pattern.permute.xlu1 %v2016_v17  ;;  %1766 = vmatprep.mubr.msk.bf16.mxu0 %vm532_vm0, %v504_v38  ;;  %v209_v38 = vadd.s32 16, %v49_v24 }
  0x17   :  { %77 = vperm.xlu1 %1969, %v36_v32   ;;  %v57_v32 = vld [vmem:[%s2743_s0 + $0xc8] sm:$0xff] }
  0x18   :  { %291 = vperm.xlu0 %1967, %v214_v33  }
  0x1b   :  { %1970 = vset.pattern.permute.xlu1 %v2015_v0 }
  0x1c   :  { %303 = vperm.xlu0 %1967, %v218_v40   ;;  %237 = vperm.xlu1 %1970, %v196_v39   ;;  %v51_v39 = vld [vmem:[%s2743_s0 + $0x98] sm:$0xff] }
  0x1d   :  { %1767 = vmatmul.mubr.msk.bf16.gmra.mrb[8].mxu0 %vm532_vm0, %v505_v47  ;;  %v211_v40 = vadd.s32 16, %v51_v39 }
  0x1e   :  { %1770 = vmatprep.mubr.msk.bf16.mxu0 %vm532_vm0, %v506_v48 }
  0x20   :  { %1992 = vset.pattern.permute.xlu0 %v2016_v17  ;;  %240 = vperm.xlu1 %1970, %v197_v44   ;;  %v55_v44 = vld [vmem:[%s2743_s0 + $0xb8] sm:$0xff] }
  0x21   :  { %65 = vperm.xlu0 %1992, %v2073_v2   ;;  %v510_v2 = vpack.c.bf16 %v489_v63, %v488_v62  ;;  %v215_v47 = vadd.s32 16, %v55_v44 }
  0x24   :  { %1971 = vset.pattern.permute.xlu1 %v2016_v17 }
  0x25   :  { %68 = vperm.xlu0 %1992, %v2085_v6   ;;  %86 = vperm.xlu1 %1971, %v39_v49   ;;  %v490_v6 = vld [vmem:[%s2745_s1 + $0xb0] sm:$0xff] }
  0x26   :  { %1771 = vmatmul.mubr.msk.bf16.gmra.mrb[12].mxu0 %vm532_vm0, %v507_v56  ;;  %v511_v11 = vpack.c.bf16 %v491_v7, %v490_v6 }
  0x27   :  { %1774 = vmatprep.mubr.msk.bf16.mxu0 %vm532_vm0, %v508_v57  ;;  %v217_v57 = vadd.s32 16, %v57_v32 }
  0x29   :  { %71 = vperm.xlu0 %1992, %v2068_v1   ;;  %1972 = vset.pattern.permute.xlu1 %v2015_v0  ;;  %v509_v1 = vpack.c.bf16 %v487_v60, %v486_v59  ;;  %v59_v60 = vld [vmem:[%s2743_s0 + $0xd8] sm:$0xff] }
  0x2a   :  { %246 = vperm.xlu1 %1972, %v199_v55  }
  0x2d   :  { %80 = vperm.xlu0 %1992, %v37_v41   ;;  %v52_v41 = vld [vmem:[%s2743_s0 + $0xa0] sm:$0xff] }
  0x2e   :  { %1973 = vset.pattern.permute.xlu1 %v2016_v17  ;;  %1775 = vmatmul.mubr.msk.bf16.gmra.mrb[16].mxu0 %vm532_vm0, %v509_v1  ;;  %v212_v42 = vadd.s32 16, %v52_v41  ;;  %v219_v1 = vadd.s32 16, %v59_v60 }
  0x2f   :  { %89 = vperm.xlu1 %1973, %v40_v61   ;;  %1778 = vmatprep.mubr.msk.bf16.mxu0 %vm532_vm0, %v510_v2  ;;  %v30_v61 = vlaneseq }
  0x31   :  { %83 = vperm.xlu0 %1992, %v2078_v3   ;;  %v201_v3 = vadd.s32 16, %v41_v5  ;;  %v2357_v2 = vand.u32 127, %v30_v61 }
  0x33   :  { %1974 = vset.pattern.permute.xlu1 %v2015_v0 }
  0x34   :  { %249 = vperm.xlu1 %1974, %v200_v4  }
  0x35   :  { %92 = vperm.xlu0 %1992, %v41_v5  }
  0x36   :  { %1779 = vmatmul.mubr.msk.bf16.gmra.mrb[20].mxu0 %vm532_vm0, %v511_v11 }
  0x37   :  { %1782 = vmatprep.mubr.msk.bf16.mxu0 %vm532_vm0, %v512_v12 }
  0x38   :  { %252 = vperm.xlu1 %1974, %v201_v3   ;;  %v60_v3 = vld [vmem:[%s2743_s0 + $0xe0] sm:$0xff] }
  0x39   :  { %95 = vperm.xlu0 %1992, %v2092_v9   ;;  %v495_v9 = vld [vmem:[%s2745_s1 + $0xd8] sm:$0xff] }
  0x3a   :  { %v513_v21 = vpack.c.bf16 %v495_v9, %v494_v16 }
  0x3c   :  { %1975 = vset.pattern.permute.xlu1 %v2016_v17 }
  0x3d   :  { %104 = vperm.xlu0 %1992, %v45_v14   ;;  %98 = vperm.xlu1 %1975, %v43_v15   ;;  %v220_v14 = vadd.s32 16, %v60_v3 }
  0x3e   :  { %1783 = vmatmul.mubr.msk.bf16.gmra.mrb[24].mxu0 %vm532_vm0, %v513_v21 }
  0x3f   :  { %1786 = vmatprep.mubr.msk.bf16.mxu0 %vm532_vm0, %v514_v23 }
  0x41   :  { %107 = vperm.xlu0 %1992, %v2104_v13   ;;  %1976 = vset.pattern.permute.xlu1 %v2015_v0  ;;  %v44_v13 = vld [vmem:[%s2743_s0 + $0x60] sm:$0xff] }
  0x42   :  { %258 = vperm.xlu1 %1976, %v203_v20   ;;  %v204_v28 = vadd.s32 16, %v44_v13 }
  0x45   :  { %116 = vperm.xlu0 %1992, %v49_v24  }
  0x46   :  { %1977 = vset.pattern.permute.xlu1 %v2016_v17  ;;  %1787 = vmatmul.mubr.msk.bf16.gmra.mrb[28].mxu0 %vm532_vm0, %v515_v27  ;;  %v63_v27 = vld [vmem:[%s2743_s0 + $0xf8] sm:$0xff] }
  0x47   :  { %101 = vperm.xlu1 %1977, %v44_v13  }
  0x49   :  { %119 = vperm.xlu0 %1992, %v2126_v22   ;;  %v47_v22 = vld [vmem:[%s2743_s0 + $0x78] sm:$0xff] }
  0x4a   :  { %v207_v33 = vadd.s32 16, %v47_v22 }
  0x4b   :  { %1978 = vset.pattern.permute.xlu1 %v2015_v0 }
  0x4c   :  { %261 = vperm.xlu1 %1978, %v204_v28  }
  0x4d   :  { %128 = vperm.xlu0 %1992, %v53_v30  }
  0x50   :  { %264 = vperm.xlu1 %1978, %v205_v31  }
  0x51   :  { %131 = vperm.xlu0 %1992, %v2140_v29   ;;  %v2309_v29 = vld [vmem:[%s2743_s0 + $0xe8] sm:$0xff] }
  0x52   :  { %v221_v19 = vadd.s32 16, %v2309_v29 }
  0x54   :  { %1979 = vset.pattern.permute.xlu1 %v2016_v17 }
  0x55   :  { %140 = vperm.xlu0 %1992, %v57_v32   ;;  %110 = vperm.xlu1 %1979, %v47_v22  }
  0x59   :  { %143 = vperm.xlu0 %1992, %v2163_v36   ;;  %1980 = vset.pattern.permute.xlu1 %v2015_v0  ;;  %v208_v36 = vadd.s32 16, %v48_v34 }
  0x5a   :  { %270 = vperm.xlu1 %1980, %v207_v33   ;;  %v223_v33 = vadd.s32 16, %v63_v27 }
  0x5d   :  { %152 = vperm.xlu0 %1992, %v2309_v29  }
  0x5e   :  { %1981 = vset.pattern.permute.xlu1 %v2016_v17 }
  0x5f   :  { %113 = vperm.xlu1 %1981, %v48_v34  }
  0x61   :  { %155 = vperm.xlu0 %1992, %v62_v35  }
  0x63   :  { %1982 = vset.pattern.permute.xlu1 %v2015_v0 }
  0x64   :  { %273 = vperm.xlu1 %1982, %v208_v36  }
  0x65   :  { %1997 = vset.pattern.permute.xlu0 %v2015_v0 }
  0x66   :  { %315 = vperm.xlu0 %1997, %v222_v37  }
  0x68   :  { %276 = vperm.xlu1 %1982, %v209_v38  }
  0x6c   :  { %1983 = vset.pattern.permute.xlu1 %v2016_v17 }
  0x6d   :  { %122 = vperm.xlu1 %1983, %v51_v39   ;;  %v2004_v39 = vld [vmem:[%s2747_s4 + $0x8] sm:$0xff]  }
  0x71   :  { %1984 = vset.pattern.permute.xlu1 %v2015_v0 }
  0x72   :  { %282 = vperm.xlu1 %1984, %v211_v40  }
  0x76   :  { %1985 = vset.pattern.permute.xlu1 %v2016_v17 }
  0x77   :  { %125 = vperm.xlu1 %1985, %v52_v41  }
  0x7b   :  { %1986 = vset.pattern.permute.xlu1 %v2015_v0 }
  0x7c   :  { %285 = vperm.xlu1 %1986, %v212_v42  }
  0x80   :  { %288 = vperm.xlu1 %1986, %v213_v43   ;;  %v2005_v43 = vld [vmem:[%s2747_s4 + $0x10] sm:$0xff]  }
  0x83   :  { %v226_v45 = vpop.permute.xlu1 %225  ;;  %v232_v46 = vpop.permute.xlu0 %231 }
  0x84   :  { %1987 = vset.pattern.permute.xlu1 %v2016_v17  ;;  %vm320_vm2 = vcmp.eq.s32.totalorder %v2357_v2, %v226_v45  ;;  %vm322_vm8 = vcmp.eq.s32.totalorder %v2357_v2, %v232_v46  ;;  %v2006_v45 = vld [vmem:[%s2747_s4 + $0x18] sm:$0xff]  }
  0x85   :  { %134 = vperm.xlu1 %1987, %v55_v44  }
  0x87   :  { %v229_v48 = vpop.permute.xlu1 %228  ;;  %v2335_v49 = vpop.permute.xlu0 %243 }
  0x88   :  { %vm321_vm4 = vcmp.eq.s32.totalorder %v2357_v2, %v229_v48  ;;  %v2007_v48 = vld [vmem:[%s2747_s4 + $0x20] sm:$0xff]  }
  0x89   :  { %1988 = vset.pattern.permute.xlu1 %v2015_v0 }
  0x8a   :  { %294 = vperm.xlu1 %1988, %v215_v47  }
  0x8b   :  { %v2338_v50 = vpop.permute.xlu0 %255 }
  0x8c   :  { %v75_v51 = vpop.permute.xlu1 %74 }
  0x8d   :  { %vm163_vm9 = vcmp.eq.s32.totalorder %v2357_v2, %v75_v51 }
  0x8e   :  { %1989 = vset.pattern.permute.xlu1 %v2016_v17 }
  0x8f   :  { %137 = vperm.xlu1 %1989, %v56_v52   ;;  %v2344_v53 = vpop.permute.xlu0 %267 }
  0x91   :  { %v235_v55 = vpop.permute.xlu1 %234 }
  0x92   :  { %vm323_vm5 = vcmp.eq.s32.totalorder %v2357_v2, %v235_v55 }
  0x93   :  { %1990 = vset.pattern.permute.xlu1 %v2015_v0  ;;  %v2347_v56 = vpop.permute.xlu0 %279  ;;  %vm355_vm10 = vmor %vm163_vm9, %vm323_vm5  ;;  %vm326_vm5 = vcmp.eq.s32.totalorder %v2357_v2, %v2335_v49 }
  0x94   :  { %297 = vperm.xlu1 %1990, %v216_v54   ;;  %v1579_v9 = vsel %vm355_vm10, 1.0, %v2017_v8 }
  0x96   :  { %v78_v58 = vpop.permute.xlu1 %77 }
  0x97   :  { %v2349_v59 = vpop.permute.xlu0 %291  ;;  %vm164_vm14 = vcmp.eq.s32.totalorder %v2357_v2, %v78_v58 }
  0x98   :  { %300 = vperm.xlu1 %1990, %v217_v57  }
  0x9b   :  { %v238_v62 = vpop.permute.xlu1 %237  ;;  %v2354_v63 = vpop.permute.xlu0 %303 }
  0x9c   :  { %1991 = vset.pattern.permute.xlu1 %v2016_v17  ;;  %vm324_vm11 = vcmp.eq.s32.totalorder %v2357_v2, %v238_v62 }
  0x9d   :  { %146 = vperm.xlu1 %1991, %v59_v60   ;;  %vm356_vm15 = vmor %vm164_vm14, %vm324_vm11 }
  0x9e   :  { %v1580_v24 = vsel %vm356_vm15, 1.0, %v2017_v8 }
  0x9f   :  { %v241_v4 = vpop.permute.xlu1 %240 }
  0xa0   :  { %v66_v5 = vpop.permute.xlu0 %65 }
  0xa1   :  { %vm160_vm1 = vcmp.eq.s32.totalorder %v2357_v2, %v66_v5  ;;  %1993 = vset.pattern.permute.xlu1 %v2015_v0 }
  0xa2   :  { %306 = vperm.xlu1 %1993, %v219_v1   ;;  %vm352_vm3 = vmor %vm160_vm1, %vm320_vm2  ;;  %vm325_vm1 = vcmp.eq.s32.totalorder %v2357_v2, %v241_v4 }
  0xa3   :  { %v1576_v10 = vsel %vm352_vm3, 1.0, %v2017_v8 }
  0xa4   :  { %v69_v6 = vpop.permute.xlu0 %68  ;;  %v87_v7 = vpop.permute.xlu1 %86 }
  0xa5   :  { %vm161_vm6 = vcmp.eq.s32.totalorder %v2357_v2, %v69_v6 }
  0xa6   :  { %vm353_vm7 = vmor %vm161_vm6, %vm321_vm4  ;;  %1994 = vset.pattern.permute.xlu1 %v2016_v17  ;;  %vm167_vm6 = vcmp.eq.s32.totalorder %v2357_v2, %v87_v7 }
  0xa7   :  { %v1577_v11 = vsel %vm353_vm7, 1.0, %v2017_v8  ;;  %149 = vperm.xlu1 %1994, %v60_v3  }
  0xa8   :  { %v448_v12 = vpack.c.bf16 %v1577_v11, %v1576_v10  ;;  %v72_v15 = vpop.permute.xlu0 %71 }
  0xa9   :  { %vm162_vm12 = vcmp.eq.s32.totalorder %v2357_v2, %v72_v15  ;;  %v247_v16 = vpop.permute.xlu1 %246 }
  0xaa   :  { %vm354_vm13 = vmor %vm162_vm12, %vm322_vm8  ;;  %1794 = vmatprep.mubr.msk.bf16.mxu0 %vm532_vm0, %v448_v12  ;;  %vm327_vm2 = vcmp.eq.s32.totalorder %v2357_v2, %v247_v16 }
  0xab   :  { %v1578_v18 = vsel %vm354_vm13, 1.0, %v2017_v8  ;;  %1995 = vset.pattern.permute.xlu1 %v2015_v0  ;;  %vm359_vm7 = vmor %vm167_vm6, %vm327_vm2 }
  0xac   :  { %v449_v20 = vpack.c.bf16 %v1579_v9, %v1578_v18  ;;  %v81_v21 = vpop.permute.xlu0 %80  ;;  %309 = vperm.xlu1 %1995, %v220_v14   ;;  %v1583_v28 = vsel %vm359_vm7, 1.0, %v2017_v8 }
  0xad   :  { %vm165_vm3 = vcmp.eq.s32.totalorder %v2357_v2, %v81_v21 }
  0xae   :  { %vm357_vm4 = vmor %vm165_vm3, %vm325_vm1  ;;  %1795 = vmatmul.mubr.msk.bf16.vlgmr.msra.gmra.mrb[0].mxu0 %vm532_vm0, %v449_v20  ;;  %v90_v23 = vpop.permute.xlu1 %89  ;;  %vm330_vm1 = vcmp.eq.s32.totalorder %v2357_v2, %v2338_v50  ;;  %v2008_v50 = vld [vmem:[%s2747_s4 + $0x28] sm:$0xff]   ;;  %v2009_v20 = vld [vmem:[%s2747_s4 + $0x30] sm:$0xff]  }
  0xaf   :  { %v1581_v25 = vsel %vm357_vm4, 1.0, %v2017_v8  ;;  %vm168_vm11 = vcmp.eq.s32.totalorder %v2357_v2, %v90_v23 }
  0xb0   :  { %v450_v26 = vpack.c.bf16 %v1581_v25, %v1580_v24  ;;  %v84_v13 = vpop.permute.xlu0 %83  ;;  %312 = vperm.xlu1 %1995, %v221_v19  }
  0xb1   :  { %vm166_vm8 = vcmp.eq.s32.totalorder %v2357_v2, %v84_v13 }
  0xb2   :  { %vm358_vm9 = vmor %vm166_vm8, %vm326_vm5  ;;  %1798 = vmatprep.mubr.msk.bf16.mxu0 %vm532_vm0, %v450_v26  ;;  %v2010_v26 = vld [vmem:[%s2747_s4 + $0x38] sm:$0xff]  }
  0xb3   :  { %v1582_v30 = vsel %vm358_vm9, 1.0, %v2017_v8  ;;  %v250_v31 = vpop.permute.xlu1 %249 }
  0xb4   :  { %v451_v32 = vpack.c.bf16 %v1583_v28, %v1582_v30  ;;  %vm328_vm10 = vcmp.eq.s32.totalorder %v2357_v2, %v250_v31  ;;  %1996 = vset.pattern.permute.xlu1 %v2016_v17  ;;  %v93_v22 = vpop.permute.xlu0 %92 }
  0xb5   :  { %158 = vperm.xlu1 %1996, %v63_v27   ;;  %vm169_vm12 = vcmp.eq.s32.totalorder %v2357_v2, %v93_v22  ;;  %vm360_vm13 = vmor %vm168_vm11, %vm328_vm10 }
  0xb6   :  { %1799 = vmatmul.mubr.msk.bf16.gmra.mrb[4].mxu0 %vm532_vm0, %v451_v32  ;;  %v1584_v34 = vsel %vm360_vm13, 1.0, %v2017_v8  ;;  %vm334_vm13 = vcmp.eq.s32.totalorder %v2357_v2, %v2344_v53 }
  0xb7   :  { %v253_v29 = vpop.permute.xlu1 %252 }
  0xb8   :  { %vm329_vm14 = vcmp.eq.s32.totalorder %v2357_v2, %v253_v29  ;;  %v96_v36 = vpop.permute.xlu0 %95 }
  0xb9   :  { %vm361_vm15 = vmor %vm169_vm12, %vm329_vm14  ;;  %1998 = vset.pattern.permute.xlu1 %v2015_v0  ;;  %vm170_vm2 = vcmp.eq.s32.totalorder %v2357_v2, %v96_v36  ;;  %v2003_v0 = vld [vmem:[%s2747_s4] sm:$0xff]  }
  0xba   :  { %v1585_v17 = vsel %vm361_vm15, 1.0, %v2017_v8  ;;  %318 = vperm.xlu1 %1998, %v223_v33   ;;  %vm362_vm3 = vmor %vm170_vm2, %vm330_vm1  ;;  %1826 = vmatprep.subr.bf16.mxu0 %v2003_v0 }
  0xbb   :  { %v452_v35 = vpack.c.bf16 %v1585_v17, %v1584_v34  ;;  %v1586_v40 = vsel %vm362_vm3, 1.0, %v2017_v8  ;;  %1914 = vmatprep.subr.bf16.mxu1 %v2003_v0  ;;  %1827 = vmatpush3.bf16.msra.mxu0 %v2003_v0 }
  0xbc   :  { %v99_v37 = vpop.permute.xlu1 %98  ;;  %1922 = vmatpush3.bf16.msra.mxu1 %v2003_v0  ;;  %1828 = vmatprep.subr.bf16.mxu0 %v2004_v39  ;;  %v105_v47 = vpop.permute.xlu0 %104 }
  0xbd   :  { %1802 = vmatprep.mubr.msk.bf16.mxu0 %vm532_vm0, %v452_v35  ;;  %vm171_vm4 = vcmp.eq.s32.totalorder %v2357_v2, %v99_v37  ;;  %1915 = vmatprep.subr.bf16.mxu1 %v2004_v39  ;;  %vm173_vm8 = vcmp.eq.s32.totalorder %v2357_v2, %v105_v47 }
  0xbf   :  { %1829 = vmatpush3.bf16.msra.mxu0 %v2004_v39 }
  0xc0   :  { %1923 = vmatpush3.bf16.msra.mxu1 %v2004_v39  ;;  %1830 = vmatprep.subr.bf16.mxu0 %v2005_v43  ;;  %v108_v57 = vpop.permute.xlu0 %107 }
  0xc1   :  { %v259_v38 = vpop.permute.xlu1 %258  ;;  %1916 = vmatprep.subr.bf16.mxu1 %v2005_v43  ;;  %vm174_vm14 = vcmp.eq.s32.totalorder %v2357_v2, %v108_v57 }
  0xc2   :  { %vm331_vm5 = vcmp.eq.s32.totalorder %v2357_v2, %v259_v38  ;;  %vm366_vm15 = vmor %vm174_vm14, %vm334_vm13 }
  0xc3   :  { %vm363_vm6 = vmor %vm171_vm4, %vm331_vm5  ;;  %1831 = vmatpush3.bf16.msra.mxu0 %v2005_v43  ;;  %v1590_v60 = vsel %vm366_vm15, 1.0, %v2017_v8 }
  0xc4   :  { %v1587_v41 = vsel %vm363_vm6, 1.0, %v2017_v8  ;;  %1924 = vmatpush3.bf16.msra.mxu1 %v2005_v43  ;;  %1832 = vmatprep.subr.bf16.mxu0 %v2006_v45  ;;  %v117_v4 = vpop.permute.xlu0 %116 }
  0xc5   :  { %v453_v42 = vpack.c.bf16 %v1587_v41, %v1586_v40  ;;  %1917 = vmatprep.subr.bf16.mxu1 %v2006_v45  ;;  %vm177_vm5 = vcmp.eq.s32.totalorder %v2357_v2, %v117_v4 }
  0xc6   :  { %v102_v44 = vpop.permute.xlu1 %101 }
  0xc7   :  { %1803 = vmatmul.mubr.msk.bf16.gmra.mrb[8].mxu0 %vm532_vm0, %v453_v42  ;;  %vm172_vm9 = vcmp.eq.s32.totalorder %v2357_v2, %v102_v44 }
  0xc8   :  { %1925 = vmatpush3.bf16.msra.mxu1 %v2006_v45  ;;  %1833 = vmatpush3.bf16.msra.mxu0 %v2006_v45  ;;  %v120_v11 = vpop.permute.xlu0 %119 }
  0xc9   :  { %1918 = vmatprep.subr.bf16.mxu1 %v2007_v48  ;;  %1834 = vmatprep.subr.bf16.mxu0 %v2007_v48 }
  0xcb   :  { %v262_v46 = vpop.permute.xlu1 %261 }
  0xcc   :  { %vm332_vm7 = vcmp.eq.s32.totalorder %v2357_v2, %v262_v46  ;;  %1926 = vmatpush3.bf16.msra.mxu1 %v2007_v48  ;;  %1835 = vmatpush3.bf16.msra.mxu0 %v2007_v48 }
  0xcd   :  { %vm364_vm10 = vmor %vm172_vm9, %vm332_vm7  ;;  %1919 = vmatprep.subr.bf16.mxu1 %v2008_v50  ;;  %1836 = vmatprep.subr.bf16.mxu0 %v2008_v50 }
  0xce   :  { %v1588_v51 = vsel %vm364_vm10, 1.0, %v2017_v8  ;;  %vm338_vm10 = vcmp.eq.s32.totalorder %v2357_v2, %v2347_v56  ;;  %v129_v56 = vpop.permute.xlu0 %128 }
  0xcf   :  { %v265_v49 = vpop.permute.xlu1 %264 }
  0xd0   :  { %vm333_vm11 = vcmp.eq.s32.totalorder %v2357_v2, %v265_v49  ;;  %1927 = vmatpush3.bf16.msra.mxu1 %v2008_v50  ;;  %1837 = vmatpush3.bf16.msra.mxu0 %v2008_v50 }
  0xd1   :  { %vm365_vm12 = vmor %vm173_vm8, %vm333_vm11  ;;  %vm178_vm11 = vcmp.eq.s32.totalorder %v2357_v2, %v120_v11  ;;  %1838 = vmatprep.subr.bf16.mxu0 %v2009_v20  ;;  %1920 = vmatprep.subr.bf16.mxu1 %v2009_v20 }
  0xd2   :  { %v1589_v52 = vsel %vm365_vm12, 1.0, %v2017_v8  ;;  %vm370_vm12 = vmor %vm178_vm11, %vm338_vm10  ;;  %v132_v13 = vpop.permute.xlu0 %131 }
  0xd3   :  { %v454_v54 = vpack.c.bf16 %v1589_v52, %v1588_v51  ;;  %v1594_v14 = vsel %vm370_vm12, 1.0, %v2017_v8 }
  0xd4   :  { %v111_v55 = vpop.permute.xlu1 %110  ;;  %1839 = vmatpush3.bf16.msra.mxu0 %v2009_v20  ;;  %1928 = vmatpush3.bf16.msra.mxu1 %v2009_v20  ;;  %v2011_v20 = vld [vmem:[%s2748_s6] sm:$0xff]  }
  0xd5   :  { %1806 = vmatprep.mubr.msk.bf16.mxu0 %vm532_vm0, %v454_v54  ;;  %vm175_vm1 = vcmp.eq.s32.totalorder %v2357_v2, %v111_v55  ;;  %1840 = vmatprep.subr.bf16.mxu0 %v2010_v26 }
  0xd6   :  { %1921 = vmatprep.subr.bf16.mxu1 %v2010_v26  ;;  %v141_v22 = vpop.permute.xlu0 %140 }
  0xd8   :  { %1841 = vmatpush3.bf16.msra.mxu0 %v2010_v26  ;;  %1929 = vmatpush3.bf16.msra.mxu1 %v2010_v26 }
  0xd9   :  { %v271_v58 = vpop.permute.xlu1 %270  ;;  %1874 = vmatprep.subr.bf16.mxu1 %v2011_v20 }
  0xda   :  { %vm335_vm2 = vcmp.eq.s32.totalorder %v2357_v2, %v271_v58  ;;  %v144_v17 = vpop.permute.xlu0 %143 }
  0xdb   :  { %vm367_vm3 = vmor %vm175_vm1, %vm335_vm2 }
  0xdc   :  { %v1591_v61 = vsel %vm367_vm3, 1.0, %v2017_v8 }
  0xdd   :  { %v455_v62 = vpack.c.bf16 %v1591_v61, %v1590_v60 }
  0xde   :  { %v114_v1 = vpop.permute.xlu1 %113  ;;  %v153_v41 = vpop.permute.xlu0 %152 }
  0xdf   :  { %1807 = vmatmul.mubr.msk.bf16.gmra.mrb[12].mxu0 %vm532_vm0, %v455_v62  ;;  %vm176_vm6 = vcmp.eq.s32.totalorder %v2357_v2, %v114_v1 }
  0xe3   :  { %v274_v53 = vpop.permute.xlu1 %273 }
  0xe4   :  { %vm336_vm4 = vcmp.eq.s32.totalorder %v2357_v2, %v274_v53 }
  0xe5   :  { %vm368_vm7 = vmor %vm176_vm6, %vm336_vm4  ;;  %vm181_vm4 = vcmp.eq.s32.totalorder %v2357_v2, %v129_v56 }
  0xe6   :  { %v1592_v6 = vsel %vm368_vm7, 1.0, %v2017_v8  ;;  %vm342_vm7 = vcmp.eq.s32.totalorder %v2357_v2, %v2349_v59 }
  0xe7   :  { %v277_v5 = vpop.permute.xlu1 %276 }
  0xe8   :  { %vm337_vm8 = vcmp.eq.s32.totalorder %v2357_v2, %v277_v5 }
  0xe9   :  { %vm369_vm9 = vmor %vm177_vm5, %vm337_vm8  ;;  %vm182_vm8 = vcmp.eq.s32.totalorder %v2357_v2, %v132_v13 }
  0xea   :  { %v1593_v7 = vsel %vm369_vm9, 1.0, %v2017_v8  ;;  %vm374_vm9 = vmor %vm182_vm8, %vm342_vm7 }
  0xeb   :  { %v456_v3 = vpack.c.bf16 %v1593_v7, %v1592_v6  ;;  %v1598_v28 = vsel %vm374_vm9, 1.0, %v2017_v8 }
  0xec   :  { %v123_v10 = vpop.permute.xlu1 %122 }
  0xed   :  { %1810 = vmatprep.mubr.msk.bf16.mxu0 %vm532_vm0, %v456_v3  ;;  %vm179_vm13 = vcmp.eq.s32.totalorder %v2357_v2, %v123_v10 }
  0xf1   :  { %v283_v12 = vpop.permute.xlu1 %282 }
  0xf2   :  { %vm339_vm14 = vcmp.eq.s32.totalorder %v2357_v2, %v283_v12 }
  0xf3   :  { %vm371_vm15 = vmor %vm179_vm13, %vm339_vm14 }
  0xf4   :  { %v1595_v15 = vsel %vm371_vm15, 1.0, %v2017_v8 }
  0xf5   :  { %v457_v16 = vpack.c.bf16 %v1595_v15, %v1594_v14 }
  0xf6   :  { %v126_v9 = vpop.permute.xlu1 %125 }
  0xf7   :  { %1811 = vmatmul.mubr.msk.bf16.gmra.mrb[16].mxu0 %vm532_vm0, %v457_v16  ;;  %vm180_vm2 = vcmp.eq.s32.totalorder %v2357_v2, %v126_v9 }
  0xfb   :  { %v286_v18 = vpop.permute.xlu1 %285 }
  0xfc   :  { %vm340_vm1 = vcmp.eq.s32.totalorder %v2357_v2, %v286_v18 }
  0xfd   :  { %vm372_vm3 = vmor %vm180_vm2, %vm340_vm1  ;;  %vm185_vm1 = vcmp.eq.s32.totalorder %v2357_v2, %v141_v22 }
  0xfe   :  { %v1596_v21 = vsel %vm372_vm3, 1.0, %v2017_v8 }
  0xff   :  { %v289_v19 = vpop.permute.xlu1 %288 }
 0x100   :  { %vm341_vm5 = vcmp.eq.s32.totalorder %v2357_v2, %v289_v19 }
 0x101   :  { %vm373_vm6 = vmor %vm181_vm4, %vm341_vm5  ;;  %vm346_vm4 = vcmp.eq.s32.totalorder %v2357_v2, %v2354_v63  ;;  %vm186_vm5 = vcmp.eq.s32.totalorder %v2357_v2, %v144_v17  ;;  %v156_v63 = vpop.permute.xlu0 %155 }
 0x102   :  { %v1597_v23 = vsel %vm373_vm6, 1.0, %v2017_v8  ;;  %vm378_vm6 = vmor %vm186_vm5, %vm346_vm4 }
 0x103   :  { %v458_v24 = vpack.c.bf16 %v1597_v23, %v1596_v21  ;;  %v1602_v0 = vsel %vm378_vm6, 1.0, %v2017_v8  ;;  %v2012_v21 = vld [vmem:[%s2748_s6 + $0x8] sm:$0xff]  }
 0x104   :  { %v135_v25 = vpop.permute.xlu1 %134 }
 0x105   :  { %1814 = vmatprep.mubr.msk.bf16.mxu0 %vm532_vm0, %v458_v24  ;;  %vm183_vm10 = vcmp.eq.s32.totalorder %v2357_v2, %v135_v25  ;;  %v316_v46 = vpop.permute.xlu0 %315 }
 0x109   :  { %v295_v27 = vpop.permute.xlu1 %294 }
 0x10a   :  { %vm343_vm11 = vcmp.eq.s32.totalorder %v2357_v2, %v295_v27 }
 0x10b   :  { %vm375_vm12 = vmor %vm183_vm10, %vm343_vm11 }
 0x10c   :  { %v1599_v30 = vsel %vm375_vm12, 1.0, %v2017_v8 }
 0x10d   :  { %v459_v31 = vpack.c.bf16 %v1599_v30, %v1598_v28 }
 0x10e   :  { %v138_v32 = vpop.permute.xlu1 %137 }
 0x10f   :  { %1815 = vmatmul.mubr.msk.bf16.gmra.mrb[20].mxu0 %vm532_vm0, %v459_v31  ;;  %vm184_vm14 = vcmp.eq.s32.totalorder %v2357_v2, %v138_v32 }
 0x113   :  { %v298_v59 = vpop.permute.xlu1 %297 }
 0x114   :  { %vm344_vm13 = vcmp.eq.s32.totalorder %v2357_v2, %v298_v59 }
 0x115   :  { %vm376_vm15 = vmor %vm184_vm14, %vm344_vm13  ;;  %vm189_vm13 = vcmp.eq.s32.totalorder %v2357_v2, %v153_v41 }
 0x116   :  { %v1600_v29 = vsel %vm376_vm15, 1.0, %v2017_v8 }
 0x117   :  { %v301_v33 = vpop.permute.xlu1 %300 }
 0x118   :  { %vm345_vm2 = vcmp.eq.s32.totalorder %v2357_v2, %v301_v33 }
 0x119   :  { %vm377_vm3 = vmor %vm185_vm1, %vm345_vm2  ;;  %vm190_vm1 = vcmp.eq.s32.totalorder %v2357_v2, %v156_v63  ;;  %vm350_vm2 = vcmp.eq.s32.totalorder %v2357_v2, %v316_v46 }
 0x11a   :  { %v1601_v34 = vsel %vm377_vm3, 1.0, %v2017_v8  ;;  %vm382_vm3 = vmor %vm190_vm1, %vm350_vm2 }
 0x11b   :  { %v460_v35 = vpack.c.bf16 %v1601_v34, %v1600_v29  ;;  %v1606_v50 = vsel %vm382_vm3, 1.0, %v2017_v8 }
 0x11c   :  { %v147_v36 = vpop.permute.xlu1 %146 }
 0x11d   :  { %1818 = vmatprep.mubr.msk.bf16.mxu0 %vm532_vm0, %v460_v35  ;;  %vm187_vm7 = vcmp.eq.s32.totalorder %v2357_v2, %v147_v36 }
 0x121   :  { %v307_v37 = vpop.permute.xlu1 %306 }
 0x122   :  { %vm347_vm8 = vcmp.eq.s32.totalorder %v2357_v2, %v307_v37 }
 0x123   :  { %vm379_vm9 = vmor %vm187_vm7, %vm347_vm8  ;;  %vm1330_vm7 = vcmask 523264  }
 0x124   :  { %v1603_v38 = vsel %vm379_vm9, 1.0, %v2017_v8 }
 0x125   :  { %v461_v39 = vpack.c.bf16 %v1603_v38, %v1602_v0 }
 0x126   :  { %v150_v40 = vpop.permute.xlu1 %149 }
 0x127   :  { %1819 = vmatmul.mubr.msk.bf16.gmra.mrb[24].mxu0 %vm532_vm0, %v461_v39  ;;  %vm188_vm11 = vcmp.eq.s32.totalorder %v2357_v2, %v150_v40 }
 0x12b   :  { %v310_v42 = vpop.permute.xlu1 %309 }
 0x12c   :  { %vm348_vm10 = vcmp.eq.s32.totalorder %v2357_v2, %v310_v42  ;;  %v2013_v42 = vld [vmem:[%s2748_s6 + $0x10] sm:$0xff]  }
 0x12d   :  { %vm380_vm12 = vmor %vm188_vm11, %vm348_vm10 }
 0x12e   :  { %v1604_v44 = vsel %vm380_vm12, 1.0, %v2017_v8 }
 0x12f   :  { %v313_v43 = vpop.permute.xlu1 %312 }
 0x130   :  { %vm349_vm14 = vcmp.eq.s32.totalorder %v2357_v2, %v313_v43  ;;  %v2014_v43 = vld [vmem:[%s2748_s6 + $0x18] sm:$0xff]  }
 0x131   :  { %vm381_vm15 = vmor %vm189_vm13, %vm349_vm14 }
 0x132   :  { %v1605_v45 = vsel %vm381_vm15, 1.0, %v2017_v8 }
 0x133   :  { %v462_v47 = vpack.c.bf16 %v1605_v45, %v1604_v44 }
 0x134   :  { %v159_v48 = vpop.permute.xlu1 %158 }
 0x135   :  { %1822 = vmatprep.mubr.msk.bf16.mxu0 %vm532_vm0, %v462_v47  ;;  %vm191_vm4 = vcmp.eq.s32.totalorder %v2357_v2, %v159_v48 }
 0x139   :  { %v319_v49 = vpop.permute.xlu1 %318 }
 0x13a   :  { %vm351_vm5 = vcmp.eq.s32.totalorder %v2357_v2, %v319_v49 }
 0x13b   :  { %vm383_vm6 = vmor %vm191_vm4, %vm351_vm5 }
 0x13c   :  { %v1607_v51 = vsel %vm383_vm6, 1.0, %v2017_v8 }
 0x13d   :  { %v463_v52 = vpack.c.bf16 %v1607_v51, %v1606_v50 }
 0x13f   :  { %1823 = vmatmul.mubr.msk.bf16.gmra.mrb[28].mxu0 %vm532_vm0, %v463_v52 }
 0x181   :  { %v1796_v54 = vpop.f32.mrb[0].mxu0 }
 0x182   :  { %v836_v55 = vpop.f32.mrb[1].mxu0  ;;  %v965_v58 = vmax.f32 %v1796_v54, 0.0 }
 0x183   :  { %v1797_v57 = vpop.f32.mrb[2].mxu0  ;;  %v963_v62 = vmax.f32 %v836_v55, 0.0 }
 0x184   :  { %v966_v60 = vmax.f32 %v1797_v57, 0.0  ;;  %v839_v61 = vpop.f32.mrb[3].mxu0 }
 0x185   :  { %v964_v1 = vmax.f32 %v839_v61, 0.0 }
 0x186   :  { %v996_v53 = vpack.c.bf16 %v966_v60, %v965_v58 }
 0x187   :  { %v995_v4 = vpack.c.bf16 %v964_v1, %v963_v62 }
 0x189   :  { %v1800_v5 = vpop.f32.mrb[4].mxu0  ;;  %1842 = vmatprep.mubr.bf16.mxu0 %v995_v4 }
 0x18a   :  { %v852_v2 = vpop.f32.mrb[5].mxu0  ;;  %1843 = vmatmul.mubr.bf16.vlgmr.msra.gmra.mrb[32].mxu0 %v996_v53  ;;  %v969_v7 = vmax.f32 %v1800_v5, 0.0 }
 0x18b   :  { %v1801_v6 = vpop.f32.mrb[6].mxu0  ;;  %v967_v10 = vmax.f32 %v852_v2, 0.0 }
 0x18c   :  { %v970_v8 = vmax.f32 %v1801_v6, 0.0  ;;  %v855_v3 = vpop.f32.mrb[7].mxu0 }
 0x18d   :  { %v968_v11 = vmax.f32 %v855_v3, 0.0 }
 0x18e   :  { %v998_v12 = vpack.c.bf16 %v970_v8, %v969_v7 }
 0x18f   :  { %v997_v14 = vpack.c.bf16 %v968_v11, %v967_v10 }
 0x191   :  { %1846 = vmatprep.mubr.bf16.mxu1 %v997_v14 }
 0x192   :  { %1847 = vmatmul.mubr.bf16.vlgmr.msra.gmra.mrb[0].mxu1 %v998_v12 }
 0x193   :  { %1875 = vmatpush3.bf16.msra.mxu1 %v2011_v20 }
 0x194   :  { %1876 = vmatprep.subr.bf16.mxu1 %v2012_v21 }
 0x197   :  { %1877 = vmatpush3.bf16.msra.mxu1 %v2012_v21 }
 0x198   :  { %1878 = vmatprep.subr.bf16.mxu1 %v2013_v42 }
 0x19a   :  { %v1804_v15 = vpop.f32.mrb[8].mxu0 }
 0x19b   :  { %v868_v16 = vpop.f32.mrb[9].mxu0  ;;  %v973_v9 = vmax.f32 %v1804_v15, 0.0  ;;  %1879 = vmatpush3.bf16.msra.mxu1 %v2013_v42  ;;  %v2528_v15 = vld [vmem:[%s2749_s5] ss:$0 sm:$0xff] }
 0x19c   :  { %v1805_v18 = vpop.f32.mrb[10].mxu0  ;;  %v971_v23 = vmax.f32 %v868_v16, 0.0  ;;  %1880 = vmatprep.subr.bf16.mxu1 %v2014_v43 }
 0x19d   :  { %v974_v56 = vmax.f32 %v1805_v18, 0.0  ;;  %v871_v19 = vpop.f32.mrb[11].mxu0 }
 0x19e   :  { %v972_v24 = vmax.f32 %v871_v19, 0.0 }
 0x19f   :  { %v1000_v25 = vpack.c.bf16 %v974_v56, %v973_v9  ;;  %1881 = vmatpush3.bf16.msra.mxu1 %v2014_v43 }
 0x1a0   :  { %v999_v26 = vpack.c.bf16 %v972_v24, %v971_v23 }
 0x1a2   :  { %1850 = vmatprep.mubr.bf16.mxu1 %v999_v26 }
 0x1a3   :  { %1851 = vmatmul.mubr.bf16.gmra.mrb[4].mxu1 %v1000_v25 }
 0x1b2   :  { %v1808_v13 = vpop.f32.mrb[12].mxu0 }
 0x1b3   :  { %v884_v27 = vpop.f32.mrb[13].mxu0  ;;  %v977_v30 = vmax.f32 %v1808_v13, 0.0 }
 0x1b4   :  { %v1809_v28 = vpop.f32.mrb[14].mxu0  ;;  %v975_v59 = vmax.f32 %v884_v27, 0.0 }
 0x1b5   :  { %v978_v31 = vmax.f32 %v1809_v28, 0.0  ;;  %v887_v32 = vpop.f32.mrb[15].mxu0 }
 0x1b6   :  { %v976_v22 = vmax.f32 %v887_v32, 0.0 }
 0x1b7   :  { %v1002_v33 = vpack.c.bf16 %v978_v31, %v977_v30 }
 0x1b8   :  { %v1001_v29 = vpack.c.bf16 %v976_v22, %v975_v59 }
 0x1ba   :  { %1854 = vmatprep.mubr.bf16.mxu1 %v1001_v29 }
 0x1bb   :  { %1855 = vmatmul.mubr.bf16.gmra.mrb[8].mxu1 %v1002_v33 }
 0x1ca   :  { %v1812_v34 = vpop.f32.mrb[16].mxu0 }
 0x1cb   :  { %v900_v17 = vpop.f32.mrb[17].mxu0  ;;  %v981_v36 = vmax.f32 %v1812_v34, 0.0 }
 0x1cc   :  { %v1813_v35 = vpop.f32.mrb[18].mxu0  ;;  %v979_v38 = vmax.f32 %v900_v17, 0.0 }
 0x1cd   :  { %v982_v37 = vmax.f32 %v1813_v35, 0.0  ;;  %v903_v0 = vpop.f32.mrb[19].mxu0 }
 0x1ce   :  { %v980_v39 = vmax.f32 %v903_v0, 0.0 }
 0x1cf   :  { %v1004_v40 = vpack.c.bf16 %v982_v37, %v981_v36 }
 0x1d0   :  { %v1003_v41 = vpack.c.bf16 %v980_v39, %v979_v38 }
 0x1d2   :  { %1858 = vmatprep.mubr.bf16.mxu1 %v1003_v41 }
 0x1d3   :  { %1859 = vmatmul.mubr.bf16.gmra.mrb[12].mxu1 %v1004_v40 }
 0x1e2   :  { %v1816_v63 = vpop.f32.mrb[20].mxu0 }
 0x1e3   :  { %v916_v44 = vpop.f32.mrb[21].mxu0  ;;  %v985_v46 = vmax.f32 %v1816_v63, 0.0 }
 0x1e4   :  { %v1817_v45 = vpop.f32.mrb[22].mxu0  ;;  %v983_v49 = vmax.f32 %v916_v44, 0.0 }
 0x1e5   :  { %v986_v47 = vmax.f32 %v1817_v45, 0.0  ;;  %v919_v48 = vpop.f32.mrb[23].mxu0 }
 0x1e6   :  { %v984_v50 = vmax.f32 %v919_v48, 0.0 }
 0x1e7   :  { %v1006_v51 = vpack.c.bf16 %v986_v47, %v985_v46 }
 0x1e8   :  { %v1005_v52 = vpack.c.bf16 %v984_v50, %v983_v49 }
 0x1ea   :  { %1862 = vmatprep.mubr.bf16.mxu1 %v1005_v52 }
 0x1eb   :  { %1863 = vmatmul.mubr.bf16.gmra.mrb[16].mxu1 %v1006_v51 }
 0x1fa   :  { %v1820_v54 = vpop.f32.mrb[24].mxu0 }
 0x1fb   :  { %v932_v55 = vpop.f32.mrb[25].mxu0  ;;  %v989_v58 = vmax.f32 %v1820_v54, 0.0 }
 0x1fc   :  { %v1821_v57 = vpop.f32.mrb[26].mxu0  ;;  %v987_v62 = vmax.f32 %v932_v55, 0.0 }
 0x1fd   :  { %v990_v60 = vmax.f32 %v1821_v57, 0.0  ;;  %v935_v61 = vpop.f32.mrb[27].mxu0 }
 0x1fe   :  { %v988_v1 = vmax.f32 %v935_v61, 0.0 }
 0x1ff   :  { %v1008_v53 = vpack.c.bf16 %v990_v60, %v989_v58 }
 0x200   :  { %v1007_v4 = vpack.c.bf16 %v988_v1, %v987_v62 }
 0x202   :  { %1866 = vmatprep.mubr.bf16.mxu1 %v1007_v4 }
 0x203   :  { %1867 = vmatmul.mubr.bf16.gmra.mrb[20].mxu1 %v1008_v53 }
 0x212   :  { %v1824_v5 = vpop.f32.mrb[28].mxu0 }
 0x213   :  { %v948_v2 = vpop.f32.mrb[29].mxu0  ;;  %v993_v7 = vmax.f32 %v1824_v5, 0.0 }
 0x214   :  { %v1825_v6 = vpop.f32.mrb[30].mxu0  ;;  %v991_v10 = vmax.f32 %v948_v2, 0.0 }
 0x215   :  { %v994_v8 = vmax.f32 %v1825_v6, 0.0  ;;  %v951_v3 = vpop.f32.mrb[31].mxu0 }
 0x216   :  { %v992_v11 = vmax.f32 %v951_v3, 0.0 }
 0x217   :  { %v1010_v12 = vpack.c.bf16 %v994_v8, %v993_v7 }
 0x218   :  { %v1009_v14 = vpack.c.bf16 %v992_v11, %v991_v10 }
 0x21a   :  { %1870 = vmatprep.mubr.bf16.mxu1 %v1009_v14 }
 0x21b   :  { %1871 = vmatmul.mubr.bf16.gmra.mrb[24].mxu1 %v1010_v12 }
 0x25d   :  { %v1844_v16 = vpop.f32.mrb[32].mxu0 }
 0x25e   :  { %v1125_v9 = vadd.f32 %v1844_v16, %v2528_v15  ;;  %v1116_v18 = vpop.f32.mrb[33].mxu0 }
 0x25f   :  { %v1117_v56 = vadd.f32 %v2528_v15, %v1116_v18  ;;  %v1845_v19 = vpop.f32.mrb[34].mxu0 }
 0x260   :  { %v1128_v20 = vadd.f32 %v1845_v19, %v2528_v15  ;;  %v1119_v21 = vpop.f32.mrb[35].mxu0  ;;  %v1245_v24 = vmax.f32 %v1125_v9, 0.0 }
 0x261   :  { %v1120_v23 = vadd.f32 %v2528_v15, %v1119_v21  ;;  %v1243_v26 = vmax.f32 %v1117_v56, 0.0 }
 0x262   :  { %v1246_v25 = vmax.f32 %v1128_v20, 0.0 }
 0x263   :  { %v1244_v13 = vmax.f32 %v1120_v23, 0.0 }
 0x264   :  { %v1276_v27 = vpack.c.bf16 %v1246_v25, %v1245_v24 }
 0x265   :  { %v1275_v28 = vpack.c.bf16 %v1244_v13, %v1243_v26  ;;  %v1848_v30 = vpop.f32.mrb[0].mxu1 }
 0x266   :  { %v1141_v31 = vadd.f32 %v1848_v30, %v2528_v15  ;;  %v1132_v32 = vpop.f32.mrb[1].mxu1 }
 0x267   :  { %v1133_v59 = vadd.f32 %v2528_v15, %v1132_v32  ;;  %v1849_v22 = vpop.f32.mrb[2].mxu1  ;;  %1882 = vmatprep.mubr.msk.bf16.mxu1 %vm1330_vm7, %v1275_v28 }
 0x268   :  { %v1144_v33 = vadd.f32 %v1849_v22, %v2528_v15  ;;  %v1135_v29 = vpop.f32.mrb[3].mxu1  ;;  %1883 = vmatmul.mubr.msk.bf16.vlgmr.msra.gmra.mrb[28].mxu1 %vm1330_vm7, %v1276_v27  ;;  %v1249_v17 = vmax.f32 %v1141_v31, 0.0 }
 0x269   :  { %v1136_v34 = vadd.f32 %v2528_v15, %v1135_v29  ;;  %v1247_v36 = vmax.f32 %v1133_v59, 0.0 }
 0x26a   :  { %v1250_v35 = vmax.f32 %v1144_v33, 0.0 }
 0x26b   :  { %v1248_v37 = vmax.f32 %v1136_v34, 0.0 }
 0x26c   :  { %v1278_v0 = vpack.c.bf16 %v1250_v35, %v1249_v17 }
 0x26d   :  { %v1277_v38 = vpack.c.bf16 %v1248_v37, %v1247_v36 }
 0x26f   :  { %1886 = vmatprep.mubr.msk.bf16.mxu1 %vm1330_vm7, %v1277_v38 }
 0x270   :  { %1887 = vmatmul.mubr.msk.bf16.gmra.mrb[32].mxu1 %vm1330_vm7, %v1278_v0 }
 0x276   :  { %v1852_v39 = vpop.f32.mrb[4].mxu1 }
 0x277   :  { %v1157_v40 = vadd.f32 %v1852_v39, %v2528_v15  ;;  %v1148_v41 = vpop.f32.mrb[5].mxu1 }
 0x278   :  { %v1149_v42 = vadd.f32 %v2528_v15, %v1148_v41  ;;  %v1853_v63 = vpop.f32.mrb[6].mxu1 }
 0x279   :  { %v1160_v43 = vadd.f32 %v1853_v63, %v2528_v15  ;;  %v1151_v44 = vpop.f32.mrb[7].mxu1  ;;  %v1253_v46 = vmax.f32 %v1157_v40, 0.0 }
 0x27a   :  { %v1152_v45 = vadd.f32 %v2528_v15, %v1151_v44  ;;  %v1251_v48 = vmax.f32 %v1149_v42, 0.0 }
 0x27b   :  { %v1254_v47 = vmax.f32 %v1160_v43, 0.0 }
 0x27c   :  { %v1252_v49 = vmax.f32 %v1152_v45, 0.0 }
 0x27d   :  { %v1280_v50 = vpack.c.bf16 %v1254_v47, %v1253_v46 }
 0x27e   :  { %v1279_v51 = vpack.c.bf16 %v1252_v49, %v1251_v48 }
 0x280   :  { %1890 = vmatprep.mubr.msk.bf16.mxu1 %vm1330_vm7, %v1279_v51 }
 0x281   :  { %1891 = vmatmul.mubr.msk.bf16.gmra.mrb[36].mxu1 %vm1330_vm7, %v1280_v50 }
 0x28e   :  { %v1856_v52 = vpop.f32.mrb[8].mxu1 }
 0x28f   :  { %v1173_v54 = vadd.f32 %v1856_v52, %v2528_v15  ;;  %v1164_v55 = vpop.f32.mrb[9].mxu1 }
 0x290   :  { %v1165_v57 = vadd.f32 %v2528_v15, %v1164_v55  ;;  %v1857_v58 = vpop.f32.mrb[10].mxu1 }
 0x291   :  { %v1176_v60 = vadd.f32 %v1857_v58, %v2528_v15  ;;  %v1167_v61 = vpop.f32.mrb[11].mxu1  ;;  %v1257_v1 = vmax.f32 %v1173_v54, 0.0 }
 0x292   :  { %v1168_v62 = vadd.f32 %v2528_v15, %v1167_v61  ;;  %v1255_v4 = vmax.f32 %v1165_v57, 0.0 }
 0x293   :  { %v1258_v53 = vmax.f32 %v1176_v60, 0.0 }
 0x294   :  { %v1256_v5 = vmax.f32 %v1168_v62, 0.0  ;;  %v2581_v62 = vld [vmem:[%s2750_s7] ss:$0 sm:$0xff] }
 0x295   :  { %v1282_v2 = vpack.c.bf16 %v1258_v53, %v1257_v1 }
 0x296   :  { %v1281_v6 = vpack.c.bf16 %v1256_v5, %v1255_v4 }
 0x298   :  { %1894 = vmatprep.mubr.msk.bf16.mxu1 %vm1330_vm7, %v1281_v6 }
 0x299   :  { %1895 = vmatmul.mubr.msk.bf16.gmra.mrb[40].mxu1 %vm1330_vm7, %v1282_v2 }
 0x2a6   :  { %v1860_v7 = vpop.f32.mrb[12].mxu1 }
 0x2a7   :  { %v1189_v8 = vadd.f32 %v1860_v7, %v2528_v15  ;;  %v1180_v3 = vpop.f32.mrb[13].mxu1 }
 0x2a8   :  { %v1181_v10 = vadd.f32 %v2528_v15, %v1180_v3  ;;  %v1861_v11 = vpop.f32.mrb[14].mxu1 }
 0x2a9   :  { %v1192_v12 = vadd.f32 %v1861_v11, %v2528_v15  ;;  %v1183_v14 = vpop.f32.mrb[15].mxu1  ;;  %v1261_v9 = vmax.f32 %v1189_v8, 0.0 }
 0x2aa   :  { %v1184_v16 = vadd.f32 %v2528_v15, %v1183_v14  ;;  %v1259_v56 = vmax.f32 %v1181_v10, 0.0 }
 0x2ab   :  { %v1262_v18 = vmax.f32 %v1192_v12, 0.0 }
 0x2ac   :  { %v1260_v19 = vmax.f32 %v1184_v16, 0.0 }
 0x2ad   :  { %v1284_v20 = vpack.c.bf16 %v1262_v18, %v1261_v9 }
 0x2ae   :  { %v1283_v21 = vpack.c.bf16 %v1260_v19, %v1259_v56 }
 0x2b0   :  { %1898 = vmatprep.mubr.msk.bf16.mxu1 %vm1330_vm7, %v1283_v21 }
 0x2b1   :  { %1899 = vmatmul.mubr.msk.bf16.gmra.mrb[44].mxu1 %vm1330_vm7, %v1284_v20 }
 0x2be   :  { %v1864_v23 = vpop.f32.mrb[16].mxu1 }
 0x2bf   :  { %v1205_v24 = vadd.f32 %v1864_v23, %v2528_v15  ;;  %v1196_v25 = vpop.f32.mrb[17].mxu1 }
 0x2c0   :  { %v1197_v26 = vadd.f32 %v2528_v15, %v1196_v25  ;;  %v1865_v13 = vpop.f32.mrb[18].mxu1 }
 0x2c1   :  { %v1208_v27 = vadd.f32 %v1865_v13, %v2528_v15  ;;  %v1199_v28 = vpop.f32.mrb[19].mxu1  ;;  %v1265_v31 = vmax.f32 %v1205_v24, 0.0 }
 0x2c2   :  { %v1200_v30 = vadd.f32 %v2528_v15, %v1199_v28  ;;  %v1263_v59 = vmax.f32 %v1197_v26, 0.0 }
 0x2c3   :  { %v1266_v32 = vmax.f32 %v1208_v27, 0.0 }
 0x2c4   :  { %v1264_v22 = vmax.f32 %v1200_v30, 0.0 }
 0x2c5   :  { %v1286_v33 = vpack.c.bf16 %v1266_v32, %v1265_v31 }
 0x2c6   :  { %v1285_v29 = vpack.c.bf16 %v1264_v22, %v1263_v59 }
 0x2c8   :  { %1902 = vmatprep.mubr.msk.bf16.mxu1 %vm1330_vm7, %v1285_v29 }
 0x2c9   :  { %1903 = vmatmul.mubr.msk.bf16.gmra.mrb[48].mxu1 %vm1330_vm7, %v1286_v33 }
 0x2d6   :  { %v1868_v34 = vpop.f32.mrb[20].mxu1 }
 0x2d7   :  { %v1221_v17 = vadd.f32 %v1868_v34, %v2528_v15  ;;  %v1212_v35 = vpop.f32.mrb[21].mxu1 }
 0x2d8   :  { %v1213_v36 = vadd.f32 %v2528_v15, %v1212_v35  ;;  %v1869_v37 = vpop.f32.mrb[22].mxu1 }
 0x2d9   :  { %v1224_v0 = vadd.f32 %v1869_v37, %v2528_v15  ;;  %v1215_v38 = vpop.f32.mrb[23].mxu1  ;;  %v1269_v40 = vmax.f32 %v1221_v17, 0.0 }
 0x2da   :  { %v1216_v39 = vadd.f32 %v2528_v15, %v1215_v38  ;;  %v1267_v42 = vmax.f32 %v1213_v36, 0.0 }
 0x2db   :  { %v1270_v41 = vmax.f32 %v1224_v0, 0.0 }
 0x2dc   :  { %v1268_v63 = vmax.f32 %v1216_v39, 0.0 }
 0x2dd   :  { %v1288_v43 = vpack.c.bf16 %v1270_v41, %v1269_v40 }
 0x2de   :  { %v1287_v44 = vpack.c.bf16 %v1268_v63, %v1267_v42 }
 0x2e0   :  { %1906 = vmatprep.mubr.msk.bf16.mxu1 %vm1330_vm7, %v1287_v44 }
 0x2e1   :  { %1907 = vmatmul.mubr.msk.bf16.gmra.mrb[52].mxu1 %vm1330_vm7, %v1288_v43 }
 0x2ee   :  { %v1872_v45 = vpop.f32.mrb[24].mxu1 }
 0x2ef   :  { %v1237_v46 = vadd.f32 %v1872_v45, %v2528_v15  ;;  %v1228_v47 = vpop.f32.mrb[25].mxu1 }
 0x2f0   :  { %v1229_v48 = vadd.f32 %v2528_v15, %v1228_v47  ;;  %v1873_v49 = vpop.f32.mrb[26].mxu1 }
 0x2f1   :  { %v1240_v50 = vadd.f32 %v1873_v49, %v2528_v15  ;;  %v1231_v51 = vpop.f32.mrb[27].mxu1  ;;  %v1273_v54 = vmax.f32 %v1237_v46, 0.0 }
 0x2f2   :  { %v1232_v52 = vadd.f32 %v2528_v15, %v1231_v51  ;;  %v1271_v57 = vmax.f32 %v1229_v48, 0.0 }
 0x2f3   :  { %v1274_v55 = vmax.f32 %v1240_v50, 0.0 }
 0x2f4   :  { %v1272_v58 = vmax.f32 %v1232_v52, 0.0 }
 0x2f5   :  { %v1290_v60 = vpack.c.bf16 %v1274_v55, %v1273_v54 }
 0x2f6   :  { %v1289_v61 = vpack.c.bf16 %v1272_v58, %v1271_v57 }
 0x2f8   :  { %1910 = vmatprep.mubr.msk.bf16.mxu1 %vm1330_vm7, %v1289_v61 }
 0x2f9   :  { %1911 = vmatmul.mubr.msk.bf16.gmra.mrb[56].mxu1 %vm1330_vm7, %v1290_v60 }
 0x33b   :  { %v1884_v1 = vpop.f32.mrb[28].mxu1 }
 0x33c   :  { %v1422_v53 = vadd.f32 %v1884_v1, %v2581_v62  ;;  %v1413_v4 = vpop.f32.mrb[29].mxu1 }
 0x33d   :  { %v1414_v15 = vadd.f32 %v2581_v62, %v1413_v4  ;;  %v1885_v5 = vpop.f32.mrb[30].mxu1 }
 0x33e   :  { %1542 = vst.msk [vmem:[%s2751_s8 + $0x10] sm:$0xff] %vm532_vm0, %v1422_v53  ;;  %v1425_v2 = vadd.f32 %v1885_v5, %v2581_v62  ;;  %v1416_v6 = vpop.f32.mrb[31].mxu1 }
 0x33f   :  { %1540 = vst.msk [vmem:[%s2751_s8] sm:$0xff] %vm532_vm0, %v1414_v15  ;;  %v1417_v7 = vadd.f32 %v2581_v62, %v1416_v6 }
 0x340   :  { %1543 = vst.msk [vmem:[%s2751_s8 + $0x18] sm:$0xff] %vm532_vm0, %v1425_v2 }
 0x341   :  { %1541 = vst.msk [vmem:[%s2751_s8 + $0x8] sm:$0xff] %vm532_vm0, %v1417_v7 }
 0x343   :  { %v1888_v8 = vpop.f32.mrb[32].mxu1 }
 0x344   :  { %v1438_v3 = vadd.f32 %v1888_v8, %v2581_v62  ;;  %v1429_v10 = vpop.f32.mrb[33].mxu1 }
 0x345   :  { %v1430_v11 = vadd.f32 %v2581_v62, %v1429_v10  ;;  %v1889_v12 = vpop.f32.mrb[34].mxu1 }
 0x346   :  { %1546 = vst.msk [vmem:[%s2751_s8 + $0x30] sm:$0xff] %vm532_vm0, %v1438_v3  ;;  %v1441_v14 = vadd.f32 %v1889_v12, %v2581_v62  ;;  %v1432_v16 = vpop.f32.mrb[35].mxu1 }
 0x347   :  { %1544 = vst.msk [vmem:[%s2751_s8 + $0x20] sm:$0xff] %vm532_vm0, %v1430_v11  ;;  %v1433_v9 = vadd.f32 %v2581_v62, %v1432_v16 }
 0x348   :  { %1547 = vst.msk [vmem:[%s2751_s8 + $0x38] sm:$0xff] %vm532_vm0, %v1441_v14 }
 0x349   :  { %1545 = vst.msk [vmem:[%s2751_s8 + $0x28] sm:$0xff] %vm532_vm0, %v1433_v9 }
 0x354   :  { %v1892_v18 = vpop.f32.mrb[36].mxu1 }
 0x355   :  { %v1454_v56 = vadd.f32 %v1892_v18, %v2581_v62  ;;  %v1445_v19 = vpop.f32.mrb[37].mxu1 }
 0x356   :  { %v1446_v20 = vadd.f32 %v2581_v62, %v1445_v19  ;;  %v1893_v21 = vpop.f32.mrb[38].mxu1 }
 0x357   :  { %1550 = vst.msk [vmem:[%s2751_s8 + $0x50] sm:$0xff] %vm532_vm0, %v1454_v56  ;;  %v1457_v23 = vadd.f32 %v1893_v21, %v2581_v62  ;;  %v1448_v24 = vpop.f32.mrb[39].mxu1 }
 0x358   :  { %1548 = vst.msk [vmem:[%s2751_s8 + $0x40] sm:$0xff] %vm532_vm0, %v1446_v20  ;;  %v1449_v25 = vadd.f32 %v2581_v62, %v1448_v24 }
 0x359   :  { %1551 = vst.msk [vmem:[%s2751_s8 + $0x58] sm:$0xff] %vm532_vm0, %v1457_v23 }
 0x35a   :  { %1549 = vst.msk [vmem:[%s2751_s8 + $0x48] sm:$0xff] %vm532_vm0, %v1449_v25 }
 0x36c   :  { %v1896_v26 = vpop.f32.mrb[40].mxu1 }
 0x36d   :  { %v1470_v13 = vadd.f32 %v1896_v26, %v2581_v62  ;;  %v1461_v27 = vpop.f32.mrb[41].mxu1 }
 0x36e   :  { %v1462_v28 = vadd.f32 %v2581_v62, %v1461_v27  ;;  %v1897_v30 = vpop.f32.mrb[42].mxu1 }
 0x36f   :  { %1554 = vst.msk [vmem:[%s2751_s8 + $0x70] sm:$0xff] %vm532_vm0, %v1470_v13  ;;  %v1473_v31 = vadd.f32 %v1897_v30, %v2581_v62  ;;  %v1464_v32 = vpop.f32.mrb[43].mxu1 }
 0x370   :  { %1552 = vst.msk [vmem:[%s2751_s8 + $0x60] sm:$0xff] %vm532_vm0, %v1462_v28  ;;  %v1465_v59 = vadd.f32 %v2581_v62, %v1464_v32 }
 0x371   :  { %1555 = vst.msk [vmem:[%s2751_s8 + $0x78] sm:$0xff] %vm532_vm0, %v1473_v31 }
 0x372   :  { %1553 = vst.msk [vmem:[%s2751_s8 + $0x68] sm:$0xff] %vm532_vm0, %v1465_v59 }
 0x384   :  { %v1900_v22 = vpop.f32.mrb[44].mxu1 }
 0x385   :  { %v1486_v33 = vadd.f32 %v1900_v22, %v2581_v62  ;;  %v1477_v29 = vpop.f32.mrb[45].mxu1 }
 0x386   :  { %v1478_v34 = vadd.f32 %v2581_v62, %v1477_v29  ;;  %v1901_v17 = vpop.f32.mrb[46].mxu1 }
 0x387   :  { %1558 = vst.msk [vmem:[%s2751_s8 + $0x90] sm:$0xff] %vm532_vm0, %v1486_v33  ;;  %v1489_v35 = vadd.f32 %v1901_v17, %v2581_v62  ;;  %v1480_v36 = vpop.f32.mrb[47].mxu1 }
 0x388   :  { %1556 = vst.msk [vmem:[%s2751_s8 + $0x80] sm:$0xff] %vm532_vm0, %v1478_v34  ;;  %v1481_v37 = vadd.f32 %v2581_v62, %v1480_v36 }
 0x389   :  { %1559 = vst.msk [vmem:[%s2751_s8 + $0x98] sm:$0xff] %vm532_vm0, %v1489_v35 }
 0x38a   :  { %1557 = vst.msk [vmem:[%s2751_s8 + $0x88] sm:$0xff] %vm532_vm0, %v1481_v37 }
 0x39c   :  { %v1904_v0 = vpop.f32.mrb[48].mxu1 }
 0x39d   :  { %v1502_v38 = vadd.f32 %v1904_v0, %v2581_v62  ;;  %v1493_v39 = vpop.f32.mrb[49].mxu1 }
 0x39e   :  { %v1494_v40 = vadd.f32 %v2581_v62, %v1493_v39  ;;  %v1905_v41 = vpop.f32.mrb[50].mxu1 }
 0x39f   :  { %1562 = vst.msk [vmem:[%s2751_s8 + $0xb0] sm:$0xff] %vm532_vm0, %v1502_v38  ;;  %v1505_v42 = vadd.f32 %v1905_v41, %v2581_v62  ;;  %v1496_v63 = vpop.f32.mrb[51].mxu1 }
 0x3a0   :  { %1560 = vst.msk [vmem:[%s2751_s8 + $0xa0] sm:$0xff] %vm532_vm0, %v1494_v40  ;;  %v1497_v43 = vadd.f32 %v2581_v62, %v1496_v63 }
 0x3a1   :  { %1563 = vst.msk [vmem:[%s2751_s8 + $0xb8] sm:$0xff] %vm532_vm0, %v1505_v42 }
 0x3a2   :  { %1561 = vst.msk [vmem:[%s2751_s8 + $0xa8] sm:$0xff] %vm532_vm0, %v1497_v43 }
 0x3b4   :  { %v1908_v44 = vpop.f32.mrb[52].mxu1 }
 0x3b5   :  { %v1518_v45 = vadd.f32 %v1908_v44, %v2581_v62  ;;  %v1509_v46 = vpop.f32.mrb[53].mxu1 }
 0x3b6   :  { %v1510_v47 = vadd.f32 %v2581_v62, %v1509_v46  ;;  %v1909_v48 = vpop.f32.mrb[54].mxu1 }
 0x3b7   :  { %1566 = vst.msk [vmem:[%s2751_s8 + $0xd0] sm:$0xff] %vm532_vm0, %v1518_v45  ;;  %v1521_v49 = vadd.f32 %v1909_v48, %v2581_v62  ;;  %v1512_v50 = vpop.f32.mrb[55].mxu1 }
 0x3b8   :  { %1564 = vst.msk [vmem:[%s2751_s8 + $0xc0] sm:$0xff] %vm532_vm0, %v1510_v47  ;;  %v1513_v51 = vadd.f32 %v2581_v62, %v1512_v50 }
 0x3b9   :  { %1567 = vst.msk [vmem:[%s2751_s8 + $0xd8] sm:$0xff] %vm532_vm0, %v1521_v49 }
 0x3ba   :  { %1565 = vst.msk [vmem:[%s2751_s8 + $0xc8] sm:$0xff] %vm532_vm0, %v1513_v51 }
 0x3cc   :  { %v1912_v52 = vpop.f32.mrb[56].mxu1 }
 0x3cd   :  { %v1534_v54 = vadd.f32 %v1912_v52, %v2581_v62  ;;  %v1525_v55 = vpop.f32.mrb[57].mxu1 }
 0x3ce   :  { %v1526_v57 = vadd.f32 %v2581_v62, %v1525_v55  ;;  %v1913_v58 = vpop.f32.mrb[58].mxu1 }
 0x3cf   :  { %1570 = vst.msk [vmem:[%s2751_s8 + $0xf0] sm:$0xff] %vm532_vm0, %v1534_v54  ;;  %v1537_v60 = vadd.f32 %v1913_v58, %v2581_v62  ;;  %v1528_v61 = vpop.f32.mrb[59].mxu1 }
 0x3d0   :  { %1568 = vst.msk [vmem:[%s2751_s8 + $0xe0] sm:$0xff] %vm532_vm0, %v1526_v57  ;;  %v1529_v1 = vadd.f32 %v2581_v62, %v1528_v61 }
 0x3d1   :  { %1571 = vst.msk [vmem:[%s2751_s8 + $0xf8] sm:$0xff] %vm532_vm0, %v1537_v60 }
 0x3d2   :  { %1569 = vst.msk [vmem:[%s2751_s8 + $0xe8] sm:$0xff] %vm532_vm0, %v1529_v1 }

</bundles_post_ra>
